<compile_context>
chip_gen: v5e
topology: v5e:2x2
jax: 0.10.0
libtpu: 0.0.40
codegen_flags: <defaults>
</compile_context>

<pallas_src>
import math

import jax
import jax.numpy as jnp
from jax.experimental import pallas as pl
from jax.experimental.pallas import tpu as pltpu

N_OUT_PAD = 16   # vis(8) | occ(1) | color(3) | 4 zero-pad rows (full sublane tile)


# ----------------------------------------------------------------------------
# Plain-JAX glue (matches PyTorch semantics)
# ----------------------------------------------------------------------------
def get_local_pos(p, grid_res):
    # torch: (p + 0.5) mod (1/grid_res), rescaled, permuted to (B, 3, N)
    p = p + 0.5
    unit = 1.0 / grid_res
    p = jnp.remainder(p, unit) / unit
    return jnp.transpose(p, (0, 2, 1))


def positional_encoding_cm(p_ch, L):
    # p_ch: (B, 3, N); output (B, 6L, N) ordered [sin f0, cos f0, sin f1, ...]
    outs = []
    for i in range(L):
        f = (2.0 ** i) * math.pi
        outs.append(jnp.sin(f * p_ch))
        outs.append(jnp.cos(f * p_ch))
    return jnp.concatenate(outs, axis=1)


def grid_sample_3d_border(vol, coords):
    """F.grid_sample 5-D, 'bilinear', padding_mode='border', align_corners=True.

    vol: (B, C, D, H, W); coords: (B, N, 3) in [-1, 1], ordered (x->W, y->H, z->D).
    Returns (B, C, N).
    """
    # TODO(synk): data-dependent trilinear gather stays in plain JAX (no clean
    # Pallas TPU gather path for this sample pattern).
    B, C, D, H, W = vol.shape

    def unnorm(c, size):
        c = (c + 1.0) * 0.5 * (size - 1)
        return jnp.clip(c, 0.0, float(size - 1))

    x = unnorm(coords[..., 0], W)
    y = unnorm(coords[..., 1], H)
    z = unnorm(coords[..., 2], D)
    x0 = jnp.floor(x); y0 = jnp.floor(y); z0 = jnp.floor(z)
    wx = (x - x0)[:, None, :]
    wy = (y - y0)[:, None, :]
    wz = (z - z0)[:, None, :]
    x0i = x0.astype(jnp.int32); y0i = y0.astype(jnp.int32); z0i = z0.astype(jnp.int32)
    x1i = jnp.minimum(x0i + 1, W - 1)
    y1i = jnp.minimum(y0i + 1, H - 1)
    z1i = jnp.minimum(z0i + 1, D - 1)

    volf = vol.reshape(B, C, D * H * W)

    def gather(zi, yi, xi):
        flat = (zi * H + yi) * W + xi
        return jnp.take_along_axis(volf, flat[:, None, :], axis=2)

    c000 = gather(z0i, y0i, x0i); c001 = gather(z0i, y0i, x1i)
    c010 = gather(z0i, y1i, x0i); c011 = gather(z0i, y1i, x1i)
    c100 = gather(z1i, y0i, x0i); c101 = gather(z1i, y0i, x1i)
    c110 = gather(z1i, y1i, x0i); c111 = gather(z1i, y1i, x1i)

    c00 = c000 * (1 - wx) + c001 * wx
    c01 = c010 * (1 - wx) + c011 * wx
    c10 = c100 * (1 - wx) + c101 * wx
    c11 = c110 * (1 - wx) + c111 * wx
    c0 = c00 * (1 - wy) + c01 * wy
    c1 = c10 * (1 - wy) + c11 * wy
    return c0 * (1 - wz) + c1 * wz


# ----------------------------------------------------------------------------
# Pallas kernel: fully fused decoder heads, channel-major (C, TN) tiles
# ----------------------------------------------------------------------------
def make_decoder_kernel(*, cg, L, hidden, block_size, vis_samples):
    H3 = 3 * hidden                 # fused branch width (fea | occ | color)
    C3 = 3 * (hidden // 2)

    def kernel(p_ref, fea_ref, xyz_ref, wa_ref, wb_ref, wc_ref, wd_ref,
               b_ref, o_ref):
        bf = jnp.bfloat16
        f32 = jnp.float32
        p = p_ref[...]                                   # (3, TN) f32
        tn = p.shape[-1]
        k_pad = wa_ref.shape[1]
        n_used = 3 + cg + 3 + 1 + 6 * L

        # Assemble the fused-conv0 activation slab once:
        #   [p | grid feats | xyz_local | 1(bias) | sin(f_i p)... | cos(f_i p)... | 0]
        # PE args computed in f32 (phase accuracy at the top frequency); one
        # bf16 cast feeds the single fused MXU pass.
        pieces = [p, fea_ref[...], xyz_ref[...], jnp.ones((1, tn), f32)]
        pieces += [jnp.sin((2.0 ** i) * math.pi * p) for i in range(L)]
        pieces += [jnp.cos((2.0 ** i) * math.pi * p) for i in range(L)]
        if k_pad > n_used:
            pieces.append(jnp.zeros((k_pad - n_used, tn), f32))
        act = jnp.concatenate(pieces, axis=0).astype(bf)  # (k_pad, TN) bf16

        def dot(w, a):
            return jnp.dot(w, a, preferred_element_type=jnp.float32)

        # fused conv0 of the three branches (bias folded via the ones row)
        h = dot(wa_ref[...], act).astype(bf)              # (3H, TN) bf16

        # fused block-diagonal ResConv blocks (fea | occ | color); bias+ReLU+cast
        # fused so intermediates are materialized once, residual add in bf16.
        off = 0
        for k in range(block_size):
            b1 = b_ref[off:off + H3, :]; off += H3
            b2 = b_ref[off:off + H3, :]; off += H3
            o = jnp.maximum(dot(wb_ref[2 * k], h) + b1, 0.0).astype(bf)
            h = h + jnp.maximum(dot(wb_ref[2 * k + 1], o) + b2, 0.0).astype(bf)

        # fused [vis1 | occ.final | color.final] + ReLU, then fused heads
        u = jnp.maximum(dot(wc_ref[...], h) + b_ref[off:off + C3, :], 0.0).astype(bf)
        off += C3
        y = dot(wd_ref[...], u) + b_ref[off:off + N_OUT_PAD, :]   # (16, TN) f32

        # sigmoid only on the 3 color rows (vis/occ stay logits; pad rows are 0)
        row = jax.lax.broadcasted_iota(jnp.int32, y.shape, 0)
        is_color = (row >= vis_samples + 1) & (row <= vis_samples + 3)
        y = jnp.where(is_color, jax.nn.sigmoid(y), y)
        o_ref[...] = y.astype(o_ref.dtype)

    return kernel


def run_heads_pallas(p_ch, fea_3d, xyz_local, packed, *, L, hidden, block_size,
                     vis_samples, tn=1024, out_dtype=jnp.bfloat16):
    """p_ch/fea_3d/xyz_local: (B, c, N) f32 channel-major. Returns (B, 16, N)."""
    B, _, N = p_ch.shape
    cg = fea_3d.shape[1]

    # Lane tile: large (amortizes ~0.35us/step overhead), but capped so the
    # grid keeps enough parallel steps to feed both v7x TensorCores.
    if N <= 128:
        tn_eff = N
    else:
        tn_eff = max(128, (min(tn, N) // 128) * 128)
        while tn_eff > 128 and B * pl.cdiv(N, tn_eff) < 16:
            tn_eff = max(128, ((tn_eff // 2) // 128) * 128)

    # Pad N so every grid step stores a full, unmasked lane tile.
    n_pad = pl.cdiv(N, tn_eff) * tn_eff
    if n_pad != N:
        pw = ((0, 0), (0, 0), (0, n_pad - N))
        p_ch = jnp.pad(p_ch, pw)
        fea_3d = jnp.pad(fea_3d, pw)
        xyz_local = jnp.pad(xyz_local, pw)

    grid = (B, n_pad // tn_eff)
    wa, wb, wc, wd, bias = (packed[k] for k in ("wa", "wb", "wc", "wd", "bias"))

    def resident(w):  # weight slab: same block every grid step (no re-fetch)
        return pl.BlockSpec(w.shape, lambda b, j, n=w.ndim: (0,) * n)

    kernel = make_decoder_kernel(cg=cg, L=L, hidden=hidden,
                                 block_size=block_size, vis_samples=vis_samples)

    out = pl.pallas_call(
        kernel,
        out_shape=jax.ShapeDtypeStruct((B, N_OUT_PAD, n_pad), out_dtype),
        grid_spec=pltpu.PrefetchScalarGridSpec(
            num_scalar_prefetch=0,
            grid=grid,
            in_specs=[
                pl.BlockSpec((None, 3, tn_eff), lambda b, j: (b, 0, j)),
                pl.BlockSpec((None, cg, tn_eff), lambda b, j: (b, 0, j)),
                pl.BlockSpec((None, 3, tn_eff), lambda b, j: (b, 0, j)),
                resident(wa), resident(wb), resident(wc), resident(wd),
                resident(bias),
            ],
            out_specs=pl.BlockSpec((None, N_OUT_PAD, tn_eff),
                                   lambda b, j: (b, 0, j)),
        ),
        compiler_params=pltpu.CompilerParams(
            dimension_semantics=("parallel", "parallel"),
            vmem_limit_bytes=32 * 1024 * 1024),
    )(p_ch, fea_3d, xyz_local, wa, wb, wc, wd, bias)

    return out[:, :, :N] if n_pad != N else out


# ----------------------------------------------------------------------------
# Parameters: PyTorch-layout init (Conv1d weight = (Cout, Cin)) + fused packing
# ----------------------------------------------------------------------------
def init_decoder_params(key, cin, hidden, block_size, vis_samples):
    kit = iter(jax.random.split(key, 64))

    def conv(cout, cin_):
        k1, k2 = jax.random.split(next(kit))
        bound = 1.0 / math.sqrt(cin_)
        W = jax.random.uniform(k1, (cout, cin_), jnp.float32, -bound, bound)
        b = jax.random.uniform(k2, (cout,), jnp.float32, -bound, bound)
        return W, b

    def resconvnet(cin_, cout_, hid, blocks, ignore_last):
        p = {"conv0": conv(hid, cin_),
             "blocks": [(conv(hid, hid), conv(hid, hid)) for _ in range(blocks)]}
        if not ignore_last:
            p["final"] = conv(cout_, hid)
        return p

    H = hidden
    return {
        "fea": resconvnet(cin, H, H, block_size, True),          # ignore_last
        "vis1": conv(H // 2, H),
        "vis2": conv(vis_samples, H // 2),
        "occ_net": resconvnet(cin, H // 2, H, block_size, False),
        "occ_head": conv(1, H // 2),
        "col_net": resconvnet(cin, H // 2, H, block_size, False),
        "col_head": conv(3, H // 2),
    }


def _block_diag(*ms):
    rows = sum(m.shape[0] for m in ms)
    cols = sum(m.shape[1] for m in ms)
    out = jnp.zeros((rows, cols), ms[0].dtype)
    r = c = 0
    for m in ms:
        out = out.at[r:r + m.shape[0], c:c + m.shape[1]].set(m)
        r += m.shape[0]
        c += m.shape[1]
    return out


def pack_params(params, *, L, cg, hidden, block_size):
    """Fuse per-branch Conv1d weights into a few resident bf16 slabs.

    PyTorch fea_in column order:
      [p(3), sin(f0)(3), cos(f0)(3), ..., sin(f_{L-1})(3), cos(f_{L-1})(3),
       grid feats(cg), xyz_local(3)]
    The fused conv0 weight is re-ordered to the in-kernel activation layout
      [p(3), grid(cg), xyz(3), 1(bias), sin_all(3L), cos_all(3L), 0-pad]
    so the kernel does ONE MXU pass instead of three tiny-K passes.
    """
    H = hidden
    wdt = jnp.bfloat16
    fea, occ, col = params["fea"], params["occ_net"], params["col_net"]

    wA = jnp.concatenate([fea["conv0"][0], occ["conv0"][0], col["conv0"][0]], 0)
    bA = jnp.concatenate([fea["conv0"][1], occ["conv0"][1], col["conv0"][1]], 0)

    n_pe = 6 * L
    idx_sin = [3 + 6 * i + j for i in range(L) for j in range(3)]
    idx_cos = [3 + 6 * i + 3 + j for i in range(L) for j in range(3)]
    idx_grid = list(range(3 + n_pe, 3 + n_pe + cg))
    idx_xyz = list(range(3 + n_pe + cg, 3 + n_pe + cg + 3))

    k_used = 3 + cg + 3 + 1 + n_pe
    k_pad = ((k_used + 15) // 16) * 16          # bf16 sublane-pack friendly
    wAf = jnp.zeros((3 * H, k_pad), jnp.float32)
    wAf = wAf.at[:, 0:3].set(wA[:, 0:3])
    wAf = wAf.at[:, 3:3 + cg].set(wA[:, idx_grid])
    wAf = wAf.at[:, 3 + cg:6 + cg].set(wA[:, idx_xyz])
    wAf = wAf.at[:, 6 + cg].set(bA)             # bias column (ones row in act)
    wAf = wAf.at[:, 7 + cg:7 + cg + 3 * L].set(wA[:, idx_sin])
    wAf = wAf.at[:, 7 + cg + 3 * L:7 + cg + 6 * L].set(wA[:, idx_cos])

    # block-diagonal fused residual blocks, stacked into one resident tensor
    wb_list, biases = [], []
    for k in range(block_size):
        (w1f, b1f), (w2f, b2f) = fea["blocks"][k]
        (w1o, b1o), (w2o, b2o) = occ["blocks"][k]
        (w1c, b1c), (w2c, b2c) = col["blocks"][k]
        wb_list.append(_block_diag(w1f, w1o, w1c))
        wb_list.append(_block_diag(w2f, w2o, w2c))
        biases += [jnp.concatenate([b1f, b1o, b1c]),
                   jnp.concatenate([b2f, b2o, b2c])]

    # fused [vis1 | occ.final | color.final]; fused heads padded to 16 rows
    wC = _block_diag(params["vis1"][0], occ["final"][0], col["final"][0])
    bC = jnp.concatenate([params["vis1"][1], occ["final"][1], col["final"][1]])
    wD = _block_diag(params["vis2"][0], params["occ_head"][0], params["col_head"][0])
    bD = jnp.concatenate([params["vis2"][1], params["occ_head"][1], params["col_head"][1]])
    n_out = wD.shape[0]
    wD = jnp.concatenate([wD, jnp.zeros((N_OUT_PAD - n_out, wD.shape[1]), wD.dtype)], 0)
    bD = jnp.concatenate([bD, jnp.zeros((N_OUT_PAD - n_out,), bD.dtype)])
    biases += [bC, bD]

    return {
        "wa": wAf.astype(wdt),
        "wb": jnp.stack(wb_list).astype(wdt),
        "wc": wC.astype(wdt),
        "wd": wD.astype(wdt),
        "bias": jnp.concatenate(biases).reshape(-1, 1).astype(jnp.float32),
    }


# ----------------------------------------------------------------------------
# Decoder forward (fea_3d_only=True path)
# ----------------------------------------------------------------------------
def decoder_forward(packed, fea_grid, fea_hrnet, p_query, center, scale, *,
                    grid_res, L, hidden, block_size, vis_samples,
                    tn=1024, out_dtype=jnp.bfloat16):
    # TODO(synk): the fea_3d_only=False branch (camera projection, 2-D image
    # grid_sample, vis_fuse / attention fusion) is config-gated off and not ported.
    del fea_hrnet  # view features unused in the fea_3d_only=True path

    p_qn = (p_query - center) / scale[:, None, None]            # (B, N, 3)
    xyz_local = get_local_pos(p_qn, grid_res)                    # (B, 3, N)
    p_qn = p_qn * 2.0
    fea_3d = grid_sample_3d_border(fea_grid, p_qn)               # (B, Cg, N)
    p_ch = jnp.transpose(p_qn, (0, 2, 1))                        # (B, 3, N)

    out = run_heads_pallas(p_ch, fea_3d, xyz_local, packed, L=L, hidden=hidden,
                           block_size=block_size, vis_samples=vis_samples,
                           tn=tn, out_dtype=out_dtype)           # (B, 16, N)

    return {"vis": out[:, :vis_samples],
            "occ": out[:, vis_samples:vis_samples + 1],
            "color": out[:, vis_samples + 1:vis_samples + 4]}


decoder_forward_jit = jax.jit(
    decoder_forward,
    static_argnames=("grid_res", "L", "hidden", "block_size", "vis_samples",
                     "tn", "out_dtype"))


# ----------------------------------------------------------------------------
# Pure-JAX f32 reference of the heads (PyTorch semantics) for validation
# ----------------------------------------------------------------------------
def heads_reference(params, x):
    def conv(wb_, a):
        w, b = wb_
        return jnp.einsum("oi,bin->bon", w, a) + b[None, :, None]

    def resnet(p, a, with_final):
        h = conv(p["conv0"], a)
        for c1, c2 in p["blocks"]:
            o = jax.nn.relu(conv(c1, h))
            h = h + jax.nn.relu(conv(c2, o))
        return conv(p["final"], h) if with_final else h

    fea = resnet(params["fea"], x, False)
    vis = conv(params["vis2"], jax.nn.relu(conv(params["vis1"], fea)))
    occ = conv(params["occ_head"], jax.nn.relu(resnet(params["occ_net"], x, True)))
    col = jax.nn.sigmoid(conv(params["col_head"],
                              jax.nn.relu(resnet(params["col_net"], x, True))))
    return vis, occ, col


# ----------------------------------------------------------------------------
if __name__ == "__main__":
    # Small config consistent with the module
    B, N, V = 2, 256, 2
    GRID_C, GRID_D = 4, 8          # cfg.model.grid_dim (feature ch), spatial res
    HIDDEN = 32                    # cfg.fea_dim
    BLOCKS = 1                     # cfg.hidden_size
    VIS_S = 8                      # cfg.vis_sample_size
    FREQ = 4                       # cfg.embedding_freq
    GRID_RES = 8                   # grid_resolution
    CIN = 3 + FREQ * 6 + GRID_C + 3   # 34

    key = jax.random.PRNGKey(0)
    ks = jax.random.split(key, 8)
    fea_grid = jax.random.normal(ks[0], (B, GRID_C, GRID_D, GRID_D, GRID_D), jnp.float32)
    fea_hrnet = jax.random.normal(ks[1], (B * V, 8, 16, 16), jnp.float32)
    p_query = jax.random.uniform(ks[2], (B, N, 3), jnp.float32, -0.4, 0.4)
    center = jax.random.uniform(ks[3], (B, 1, 3), jnp.float32, -0.05, 0.05)
    scale = jax.random.uniform(ks[4], (B,), jnp.float32, 0.9, 1.1)

    params = init_decoder_params(jax.random.PRNGKey(42), CIN, HIDDEN, BLOCKS, VIS_S)
    packed = pack_params(params, L=FREQ, cg=GRID_C, hidden=HIDDEN, block_size=BLOCKS)

    out = decoder_forward_jit(packed, fea_grid, fea_hrnet, p_query, center, scale,
                              grid_res=GRID_RES, L=FREQ, hidden=HIDDEN,
                              block_size=BLOCKS, vis_samples=VIS_S, tn=1024)
    out = jax.block_until_ready(out)

    assert out["vis"].shape == (B, VIS_S, N)
    assert out["occ"].shape == (B, 1, N)
    assert out["color"].shape == (B, 3, N)

    # f32 reference with the original (unfused, PyTorch-layout) parameters
    p_qn = (p_query - center) / scale[:, None, None]
    xyz_local = get_local_pos(p_qn, GRID_RES)
    p_qn = p_qn * 2.0
    fea_3d = grid_sample_3d_border(fea_grid, p_qn)
    p_ch = jnp.transpose(p_qn, (0, 2, 1))
    x_ref = jnp.concatenate(
        [p_ch, positional_encoding_cm(p_ch, FREQ), fea_3d, xyz_local], axis=1)
    vis_r, occ_r, col_r = heads_reference(params, x_ref)

    def maxdiff(a, b):
        return float(jnp.max(jnp.abs(a.astype(jnp.float32) - b)))

    assert maxdiff(out["vis"], vis_r) < 0.1    # bf16 weights/activations
    assert maxdiff(out["occ"], occ_r) < 0.1
    assert maxdiff(out["color"], col_r) < 0.05
    assert bool(jnp.all(jnp.isfinite(out["vis"].astype(jnp.float32))))
    assert bool(jnp.all(jnp.isfinite(out["occ"].astype(jnp.float32))))
    assert bool(jnp.all((out["color"] >= 0.0) & (out["color"] <= 1.0)))

    print("KERNEL_OK")
</pallas_src>

<mosaic_0001>
module attributes {stable_mosaic.version = 11 : i64} {
  func.func @kernel(%arg0: i32, %arg1: i32, %arg2: memref<1x3x128xf32, #tpu.memory_space<vmem>>, %arg3: memref<1x4x128xf32, #tpu.memory_space<vmem>>, %arg4: memref<1x3x128xf32, #tpu.memory_space<vmem>>, %arg5: memref<96x48xbf16, #tpu.memory_space<vmem>>, %arg6: memref<2x96x96xbf16, #tpu.memory_space<vmem>>, %arg7: memref<48x96xbf16, #tpu.memory_space<vmem>>, %arg8: memref<16x48xbf16, #tpu.memory_space<vmem>>, %arg9: memref<256x1xf32, #tpu.memory_space<vmem>>, %arg10: memref<1x16x128xbf16, #tpu.memory_space<vmem>>) attributes {dimension_semantics = [#tpu.dimension_semantics<parallel>, #tpu.dimension_semantics<parallel>], iteration_bounds = array<i64: 2, 2>, scalar_prefetch = 0 : i64, scratch_operands = 0 : i64, tpu.core_type = #tpu.core_type<tc>, window_params = [{transform_indices = @transform_0, window_bounds = array<i64: 1, 3, 128>}, {transform_indices = @transform_1, window_bounds = array<i64: 1, 4, 128>}, {transform_indices = @transform_2, window_bounds = array<i64: 1, 3, 128>}, {pipeline_mode = #tpu.pipeline_mode<synchronous>, transform_indices = @transform_3, window_bounds = array<i64: 96, 48>}, {pipeline_mode = #tpu.pipeline_mode<synchronous>, transform_indices = @transform_4, window_bounds = array<i64: 2, 96, 96>}, {pipeline_mode = #tpu.pipeline_mode<synchronous>, transform_indices = @transform_5, window_bounds = array<i64: 48, 96>}, {pipeline_mode = #tpu.pipeline_mode<synchronous>, transform_indices = @transform_6, window_bounds = array<i64: 16, 48>}, {pipeline_mode = #tpu.pipeline_mode<synchronous>, transform_indices = @transform_7, window_bounds = array<i64: 256, 1>}, {transform_indices = @transform_8, window_bounds = array<i64: 1, 16, 128>}]} {
    %c0 = arith.constant 0 : index
    %c0_0 = arith.constant 0 : index
    %c0_1 = arith.constant 0 : index
    %0 = vector.load %arg2[%c0, %c0_0, %c0_1] : memref<1x3x128xf32, #tpu.memory_space<vmem>>, vector<1x3x128xf32>
    %1 = vector.shape_cast %0 : vector<1x3x128xf32> to vector<3x128xf32>
    %c0_2 = arith.constant 0 : index
    %c0_3 = arith.constant 0 : index
    %c0_4 = arith.constant 0 : index
    %2 = vector.load %arg3[%c0_2, %c0_3, %c0_4] : memref<1x4x128xf32, #tpu.memory_space<vmem>>, vector<1x4x128xf32>
    %3 = vector.shape_cast %2 : vector<1x4x128xf32> to vector<4x128xf32>
    %c0_5 = arith.constant 0 : index
    %c0_6 = arith.constant 0 : index
    %c0_7 = arith.constant 0 : index
    %4 = vector.load %arg4[%c0_5, %c0_6, %c0_7] : memref<1x3x128xf32, #tpu.memory_space<vmem>>, vector<1x3x128xf32>
    %5 = vector.shape_cast %4 : vector<1x3x128xf32> to vector<3x128xf32>
    %cst = arith.constant 1.000000e+00 : f32
    %6 = vector.broadcast %cst : f32 to vector<1x128xf32>
    %cst_8 = arith.constant 3.14159274 : f32
    %7 = vector.broadcast %cst_8 : f32 to vector<3x128xf32>
    %8 = arith.mulf %7, %1 : vector<3x128xf32>
    %9 = math.sin %8 : vector<3x128xf32>
    %cst_9 = arith.constant 6.28318548 : f32
    %10 = vector.broadcast %cst_9 : f32 to vector<3x128xf32>
    %11 = arith.mulf %10, %1 : vector<3x128xf32>
    %12 = math.sin %11 : vector<3x128xf32>
    %cst_10 = arith.constant 12.566371 : f32
    %13 = vector.broadcast %cst_10 : f32 to vector<3x128xf32>
    %14 = arith.mulf %13, %1 : vector<3x128xf32>
    %15 = math.sin %14 : vector<3x128xf32>
    %cst_11 = arith.constant 25.1327419 : f32
    %16 = vector.broadcast %cst_11 : f32 to vector<3x128xf32>
    %17 = arith.mulf %16, %1 : vector<3x128xf32>
    %18 = math.sin %17 : vector<3x128xf32>
    %cst_12 = arith.constant 3.14159274 : f32
    %19 = vector.broadcast %cst_12 : f32 to vector<3x128xf32>
    %20 = arith.mulf %19, %1 : vector<3x128xf32>
    %21 = math.cos %20 : vector<3x128xf32>
    %cst_13 = arith.constant 6.28318548 : f32
    %22 = vector.broadcast %cst_13 : f32 to vector<3x128xf32>
    %23 = arith.mulf %22, %1 : vector<3x128xf32>
    %24 = math.cos %23 : vector<3x128xf32>
    %cst_14 = arith.constant 12.566371 : f32
    %25 = vector.broadcast %cst_14 : f32 to vector<3x128xf32>
    %26 = arith.mulf %25, %1 : vector<3x128xf32>
    %27 = math.cos %26 : vector<3x128xf32>
    %cst_15 = arith.constant 25.1327419 : f32
    %28 = vector.broadcast %cst_15 : f32 to vector<3x128xf32>
    %29 = arith.mulf %28, %1 : vector<3x128xf32>
    %30 = math.cos %29 : vector<3x128xf32>
    %cst_16 = arith.constant 0.000000e+00 : f32
    %31 = vector.broadcast %cst_16 : f32 to vector<13x128xf32>
    %32 = tpu.concatenate %1, %3, %5, %6, %9, %12, %15, %18, %21, %24, %27, %30, %31 in 0 : vector<3x128xf32>, vector<4x128xf32>, vector<3x128xf32>, vector<1x128xf32>, vector<3x128xf32>, vector<3x128xf32>, vector<3x128xf32>, vector<3x128xf32>, vector<3x128xf32>, vector<3x128xf32>, vector<3x128xf32>, vector<3x128xf32>, vector<13x128xf32> -> vector<48x128xf32>
    %33 = arith.truncf %32 : vector<48x128xf32> to vector<48x128xbf16>
    %c0_17 = arith.constant 0 : index
    %c0_18 = arith.constant 0 : index
    %34 = vector.load %arg5[%c0_17, %c0_18] : memref<96x48xbf16, #tpu.memory_space<vmem>>, vector<96x48xbf16>
    %cst_19 = arith.constant dense<0.000000e+00> : vector<96x128xf32>
    %35 = tpu.matmul %34, %33, %cst_19 {dimension_numbers = #tpu.dot_dimension_numbers<[1], [0], [0], [1], [0, 0, 1, 1], [], []>} : vector<96x48xbf16>, vector<48x128xbf16>, vector<96x128xf32> -> vector<96x128xf32>
    %36 = arith.truncf %35 : vector<96x128xf32> to vector<96x128xbf16>
    %c0_20 = arith.constant 0 : index
    %c0_21 = arith.constant 0 : index
    %37 = vector.load %arg9[%c0_20, %c0_21] : memref<256x1xf32, #tpu.memory_space<vmem>>, vector<96x1xf32>
    %c96 = arith.constant 96 : index
    %c0_22 = arith.constant 0 : index
    %38 = vector.load %arg9[%c96, %c0_22] : memref<256x1xf32, #tpu.memory_space<vmem>>, vector<96x1xf32>
    %c0_23 = arith.constant 0 : index
    %c0_24 = arith.constant 0 : index
    %c0_25 = arith.constant 0 : index
    %39 = vector.load %arg6[%c0_23, %c0_24, %c0_25] : memref<2x96x96xbf16, #tpu.memory_space<vmem>>, vector<1x96x96xbf16>
    %40 = vector.shape_cast %39 : vector<1x96x96xbf16> to vector<96x96xbf16>
    %cst_26 = arith.constant dense<0.000000e+00> : vector<96x128xf32>
    %41 = tpu.matmul %40, %36, %cst_26 {dimension_numbers = #tpu.dot_dimension_numbers<[1], [0], [0], [1], [0, 0, 1, 1], [], []>} : vector<96x96xbf16>, vector<96x128xbf16>, vector<96x128xf32> -> vector<96x128xf32>
    %42 = vector.broadcast %37 : vector<96x1xf32> to vector<96x128xf32>
    %43 = arith.addf %41, %42 : vector<96x128xf32>
    %cst_27 = arith.constant 0.000000e+00 : f32
    %44 = vector.broadcast %cst_27 : f32 to vector<96x128xf32>
    %45 = arith.maximumf %43, %44 : vector<96x128xf32>
    %46 = arith.truncf %45 : vector<96x128xf32> to vector<96x128xbf16>
    %c1 = arith.constant 1 : index
    %c0_28 = arith.constant 0 : index
    %c0_29 = arith.constant 0 : index
    %47 = vector.load %arg6[%c1, %c0_28, %c0_29] : memref<2x96x96xbf16, #tpu.memory_space<vmem>>, vector<1x96x96xbf16>
    %48 = vector.shape_cast %47 : vector<1x96x96xbf16> to vector<96x96xbf16>
    %cst_30 = arith.constant dense<0.000000e+00> : vector<96x128xf32>
    %49 = tpu.matmul %48, %46, %cst_30 {dimension_numbers = #tpu.dot_dimension_numbers<[1], [0], [0], [1], [0, 0, 1, 1], [], []>} : vector<96x96xbf16>, vector<96x128xbf16>, vector<96x128xf32> -> vector<96x128xf32>
    %50 = vector.broadcast %38 : vector<96x1xf32> to vector<96x128xf32>
    %51 = arith.addf %49, %50 : vector<96x128xf32>
    %cst_31 = arith.constant 0.000000e+00 : f32
    %52 = vector.broadcast %cst_31 : f32 to vector<96x128xf32>
    %53 = arith.maximumf %51, %52 : vector<96x128xf32>
    %54 = arith.truncf %53 : vector<96x128xf32> to vector<96x128xbf16>
    %55 = arith.addf %36, %54 : vector<96x128xbf16>
    %c0_32 = arith.constant 0 : index
    %c0_33 = arith.constant 0 : index
    %56 = vector.load %arg7[%c0_32, %c0_33] : memref<48x96xbf16, #tpu.memory_space<vmem>>, vector<48x96xbf16>
    %cst_34 = arith.constant dense<0.000000e+00> : vector<48x128xf32>
    %57 = tpu.matmul %56, %55, %cst_34 {dimension_numbers = #tpu.dot_dimension_numbers<[1], [0], [0], [1], [0, 0, 1, 1], [], []>} : vector<48x96xbf16>, vector<96x128xbf16>, vector<48x128xf32> -> vector<48x128xf32>
    %c192 = arith.constant 192 : index
    %c0_35 = arith.constant 0 : index
    %58 = vector.load %arg9[%c192, %c0_35] : memref<256x1xf32, #tpu.memory_space<vmem>>, vector<48x1xf32>
    %59 = vector.broadcast %58 : vector<48x1xf32> to vector<48x128xf32>
    %60 = arith.addf %57, %59 : vector<48x128xf32>
    %cst_36 = arith.constant 0.000000e+00 : f32
    %61 = vector.broadcast %cst_36 : f32 to vector<48x128xf32>
    %62 = arith.maximumf %60, %61 : vector<48x128xf32>
    %63 = arith.truncf %62 : vector<48x128xf32> to vector<48x128xbf16>
    %c0_37 = arith.constant 0 : index
    %c0_38 = arith.constant 0 : index
    %64 = vector.load %arg8[%c0_37, %c0_38] : memref<16x48xbf16, #tpu.memory_space<vmem>>, vector<16x48xbf16>
    %cst_39 = arith.constant dense<0.000000e+00> : vector<16x128xf32>
    %65 = tpu.matmul %64, %63, %cst_39 {dimension_numbers = #tpu.dot_dimension_numbers<[1], [0], [0], [1], [0, 0, 1, 1], [], []>} : vector<16x48xbf16>, vector<48x128xbf16>, vector<16x128xf32> -> vector<16x128xf32>
    %c240 = arith.constant 240 : index
    %c0_40 = arith.constant 0 : index
    %66 = vector.load %arg9[%c240, %c0_40] : memref<256x1xf32, #tpu.memory_space<vmem>>, vector<16x1xf32>
    %67 = vector.broadcast %66 : vector<16x1xf32> to vector<16x128xf32>
    %68 = arith.addf %65, %67 : vector<16x128xf32>
    %69 = tpu.iota {dimensions = array<i32: 0>} : vector<16x128xi32>
    %c9_i32 = arith.constant 9 : i32
    %70 = vector.broadcast %c9_i32 : i32 to vector<16x128xi32>
    %71 = arith.cmpi sge, %69, %70 : vector<16x128xi32>
    %c11_i32 = arith.constant 11 : i32
    %72 = vector.broadcast %c11_i32 : i32 to vector<16x128xi32>
    %73 = arith.cmpi sle, %69, %72 : vector<16x128xi32>
    %74 = arith.andi %71, %73 : vector<16x128xi1>
    %75 = arith.negf %68 : vector<16x128xf32>
    %76 = math.exp %75 : vector<16x128xf32>
    %cst_41 = arith.constant 1.000000e+00 : f32
    %77 = vector.broadcast %cst_41 : f32 to vector<16x128xf32>
    %78 = arith.addf %77, %76 : vector<16x128xf32>
    %79 = arith.divf %77, %78 : vector<16x128xf32>
    %80 = arith.select %74, %79, %68 : vector<16x128xi1>, vector<16x128xf32>
    %81 = arith.truncf %80 : vector<16x128xf32> to vector<16x128xbf16>
    %c0_42 = arith.constant 0 : index
    %c0_43 = arith.constant 0 : index
    %c0_44 = arith.constant 0 : index
    %82 = vector.load %arg10[%c0_42, %c0_43, %c0_44] : memref<1x16x128xbf16, #tpu.memory_space<vmem>>, vector<1x16x128xbf16>
    %83 = vector.shape_cast %82 : vector<1x16x128xbf16> to vector<16x128xbf16>
    %84 = vector.shape_cast %81 : vector<16x128xbf16> to vector<1x16x128xbf16>
    tpu.vector_store %arg10[%c0_42, %c0_43, %c0_44], %84 {strides = array<i32>} : memref<1x16x128xbf16, #tpu.memory_space<vmem>>, vector<1x16x128xbf16>,
    return
  }
  func.func @transform_0(%arg0: i32, %arg1: i32) -> (i32, i32, i32) {
    %c0_i32 = arith.constant 0 : i32
    %c0_i32_0 = arith.constant 0 : i32
    return %arg0, %c0_i32, %arg1 : i32, i32, i32
  }
  func.func @transform_1(%arg0: i32, %arg1: i32) -> (i32, i32, i32) {
    %c0_i32 = arith.constant 0 : i32
    %c0_i32_0 = arith.constant 0 : i32
    return %arg0, %c0_i32, %arg1 : i32, i32, i32
  }
  func.func @transform_2(%arg0: i32, %arg1: i32) -> (i32, i32, i32) {
    %c0_i32 = arith.constant 0 : i32
    %c0_i32_0 = arith.constant 0 : i32
    return %arg0, %c0_i32, %arg1 : i32, i32, i32
  }
  func.func @transform_3(%arg0: i32, %arg1: i32) -> (i32, i32) {
    %c0_i32 = arith.constant 0 : i32
    %c0_i32_0 = arith.constant 0 : i32
    %c0_i32_1 = arith.constant 0 : i32
    return %c0_i32, %c0_i32_0 : i32, i32
  }
  func.func @transform_4(%arg0: i32, %arg1: i32) -> (i32, i32, i32) {
    %c0_i32 = arith.constant 0 : i32
    %c0_i32_0 = arith.constant 0 : i32
    %c0_i32_1 = arith.constant 0 : i32
    %c0_i32_2 = arith.constant 0 : i32
    return %c0_i32, %c0_i32_0, %c0_i32_1 : i32, i32, i32
  }
  func.func @transform_5(%arg0: i32, %arg1: i32) -> (i32, i32) {
    %c0_i32 = arith.constant 0 : i32
    %c0_i32_0 = arith.constant 0 : i32
    %c0_i32_1 = arith.constant 0 : i32
    return %c0_i32, %c0_i32_0 : i32, i32
  }
  func.func @transform_6(%arg0: i32, %arg1: i32) -> (i32, i32) {
    %c0_i32 = arith.constant 0 : i32
    %c0_i32_0 = arith.constant 0 : i32
    %c0_i32_1 = arith.constant 0 : i32
    return %c0_i32, %c0_i32_0 : i32, i32
  }
  func.func @transform_7(%arg0: i32, %arg1: i32) -> (i32, i32) {
    %c0_i32 = arith.constant 0 : i32
    %c0_i32_0 = arith.constant 0 : i32
    %c0_i32_1 = arith.constant 0 : i32
    return %c0_i32, %c0_i32_0 : i32, i32
  }
  func.func @transform_8(%arg0: i32, %arg1: i32) -> (i32, i32, i32) {
    %c0_i32 = arith.constant 0 : i32
    %c0_i32_0 = arith.constant 0 : i32
    return %arg0, %c0_i32, %arg1 : i32, i32, i32
  }
}

</mosaic_0001>

<bundles_post_ra>
// kernel: decoder_forward.1
= control target key start
LH: loop header
LB: loop body
LE: loop exit
PB: predicated region body
PF: predicated region fallthrough
CT: control target
= control target key end

     0   :  { %s2981_s27 = smov 0   ;;  %s2983_s28 = smov 0   ;;  %s3821_s0 = inlined_call_operand.vmem [shape: f32[2,3,256], index: 0, kind: input, shape index: {}]   ;;  %s3822_s1 = inlined_call_operand.vmem [shape: f32[2,4,256], index: 1, kind: input, shape index: {}]   ;;  %s3823_s2 = inlined_call_operand.vmem [shape: f32[2,3,256], index: 2, kind: input, shape index: {}]   ;;  %s3824_s3 = inlined_call_operand.vmem [shape: bf16[96,48], index: 3, kind: input, shape index: {}]   ;;  %s3825_s4 = inlined_call_operand.vmem [shape: bf16[2,96,96], index: 4, kind: input, shape index: {}]   ;;  %s3826_s5 = inlined_call_operand.vmem [shape: bf16[48,96], index: 5, kind: input, shape index: {}]   ;;  %s3827_s6 = inlined_call_operand.vmem [shape: bf16[16,48], index: 6, kind: input, shape index: {}]   ;;  %s3828_s7 = inlined_call_operand.vmem [shape: f32[256,1], index: 7, kind: input, shape index: {}]   ;;  %s3829_s8 = inlined_call_operand.vmem [shape: bf16[2,16,256], index: 8, kind: output, shape index: {}]  }
   0x1   :  { %s2985_s29 = smov 0   ;;  %s2987_s30 = smov 0  }
   0x2   :  { %s2989_s9 = smov 0   ;;  %s2991_s10 = smov 0  }
   0x3   :  { %s2993_s11 = smov 0  }
   0x4 LB: > { %s27_s12 = sadd.s32 1, %s2918_s9  ;;  %s30_s13 = sadd.s32 1, %s2922_s10  ;;  %s2926_s11 = sphi %s2993_s11, %s18_s11   ;;  %s2922_s10 = sphi %s2991_s10, %s3844_s10   ;;  %s2918_s9 = sphi %s2989_s9, %s3843_s9   ;;  %s2914_s30 = sphi %s2987_s30, %s3842_s30   ;;  %s2910_s29 = sphi %s2985_s29, %s3841_s29   ;;  %s2906_s28 = sphi %s2983_s28, %s3840_s28   ;;  %s2902_s27 = sphi %s2981_s27, %s3839_s27  }
   0x5   : > { %p28_p0 = scmp.ge.s32.totalorder %s27_s12, 2  ;;  %s2605_s14 = sadd.s32 4294967295, %s2926_s11  }
   0x6   : > { %p238_p1 = scmp.ne.s32.totalorder %s2906_s28, %s2902_s27  ;;  %p239_p2 = scmp.eq.s32.totalorder %s2605_s14, 3 }
   0x7   : > { %s3846_s12 = smov (%p28_p0, %s27_s12), 0  ;;  %s3848_s13 = smov (!%p28_p0, %s30_s13), %s2922_s10 }
   0x8   : > { %s224_s15 = ssub.s32 %s2918_s9, %s3846_s12  ;;  %p32_p3 = scmp.ge.s32.totalorder %s3848_s13, 2 }
   0x9   : > { %p2609_p4 = scmp.ge.s32.totalorder %s2926_s11, 1  ;;  %p3027_p5 = por %p239_p2, %p238_p1 }
   0xa   : > { %p311_p6 = scmp.lt.s32.totalorder %s2926_s11, 5  ;;  %s3850_s13 = smov (%p32_p3, %s3848_s13), 0 }
   0xb   : > { %s223_s17 = ssub.s32 %s2922_s10, %s3850_s13  ;;  %s228_s19 = sadd.s32 1, %s2906_s28 }
   0xc   : > { %p312_p7 = pnand %p2609_p4, %p311_p6  ;;  %s225_s18 = sor.u32 %s224_s15, %s223_s17 }
   0xd   : > { %p226_p8 = scmp.eq.s32.totalorder %s225_s18, 0  ;;  %p363_p9 = scmp.lt.s32.totalorder (!%p312_p7), %s2914_s30, 1 }
   0xe   : > { %315 = sbr.rel (%p312_p7) target bundleno = 1341 (0x53d), region = 52  ;;  %p365_p10 = scmp.lt.s32.totalorder (!%p312_p7), %s2910_s29, 1 }
   0xf   : > { %s3038_s20 = scalar_select %p226_p8, %s2906_s28, %s228_s19  }
  0x13   : > { %s364_s21 = scalar_select %p363_p9, %s2914_s30, 1  ;;  %v2928_v0 = vmov 0   ;;  %v2929_v30 = vmov 683565275   ;;  %v2930_v32 = vmov 2475754826  }
  0x14   : > { %s366_s22 = scalar_select %p365_p10, %s2910_s29, 1  ;;  %2865 = vset.pattern.permute.xlu1 %v2928_v0  ;;  %2864 = vset.pattern.permute.xlu0 %v2928_v0  ;;  %v2931_v34 = vmov 2131351028   ;;  %v2932_v36 = vmov 2102212464  }
  0x15   : > { %s2611_s23 = sshll.u32 %s364_s21, 1  ;;  %2866 = vset.pattern.permute.xlu2 %v2928_v0  ;;  %v2933_v38 = vmov 920167782   ;;  %v2934_v47 = vmov 1326507024  }
  0x16   : > { %s368_s24 = sadd.s32 %s2611_s23, %s366_s22  ;;  %s360_s22 = sand.u32 1, %s2902_s27  }
  0x17   : > { %s3047_s25 = sshll.u32 %s368_s24, 2  ;;  %s2769_s27 = sshll.u32 (%p3027_p5), %s2914_s30, 2 }
  0x18   : > { %s3053_s15 = scalar_lea.vmem %s3821_s0, %s3047_s25  ;;  %s386_s19 = scalar_lea.vmem %s3823_s2, %s3047_s25 }
  0x19   : > { %v3056_v1 = vld [vmem:[%s3053_s15] sm:$0x7]  ;;  %s378_s23 = scalar_lea.vmem %s3822_s1, %s3047_s25  ;;  %s2451_s25 = sadd.s32 (%p3027_p5), %s2910_s29, %s2769_s27 }
  0x1a   : > { %v3059_v2 = vmul.f32 25.132742, %v3056_v1  ;;  %v3062_v3 = vmul.f32 3.1415927, %v3056_v1  ;;  %v3065_v4 = vmul.f32 6.2831855, %v3056_v1 }
  0x1b   : > { %s2770_s26 = sshll.u32 (%p3027_p5), %s2451_s25, 2 }
  0x1c   : > { %v860_v5 = vand.u32 2147483647, %v3059_v2  ;;  %v863_v6 = vand.u32 2139095040, %v3059_v2  ;;  %v392_v7 = vand.u32 2147483647, %v3062_v3  ;;  %v395_v8 = vand.u32 2139095040, %v3062_v3  ;;  %s2453_s17 = scalar_lea.vmem (%p3027_p5), %s3829_s8, %s2770_s26 }
  0x1d   : > { %v551_v9 = vand.u32 2139095040, %v3065_v4 }
  0x1e   : > { %v864_v10 = vshrl.u32 %v863_v6, 23  ;;  %v867_v11 = vand.u32 8388607, %v860_v5  ;;  %v396_v12 = vshrl.u32 %v395_v8, 23  ;;  %v399_v13 = vand.u32 8388607, %v392_v7 }
  0x1f   : > { %v552_v17 = vshrl.u32 %v551_v9, 23 }
  0x20   : > { %v2626_v14 = vadd.s32 4294967169, %v864_v10  ;;  %v868_v15 = vor.u32 8388608, %v867_v11  ;;  %v2617_v16 = vadd.s32 4294967169, %v396_v12  ;;  %v400_v19 = vor.u32 8388608, %v399_v13 }
  0x21   : > { %v2620_v23 = vadd.s32 4294967169, %v552_v17 }
  0x22   : > { %v870_v18 = vadd.s32 1, %v2626_v14  ;;  %v402_v20 = vadd.s32 1, %v2617_v16  ;;  %v3076_v22 = vshll.u32 %v868_v15, 8  ;;  %v3082_v28 = vshll.u32 %v400_v19, 8 }
  0x23   : > { %v3090_v41 = vadd.s32 1, %v2620_v23 }
  0x24   : > { %vm871_vm0 = vcmp.gt.s32.totalorder %v870_v18, 0  ;;  %vm403_vm1 = vcmp.gt.s32.totalorder %v402_v20, 0  ;;  %v909_v40 = vand.u32 65535, %v3076_v22  ;;  %v910_v45 = vshrl.u32 %v3076_v22, 16 }
  0x25   : > { %v872_v21 = vsel %vm871_vm0, %v870_v18, 0  ;;  %v404_v25 = vsel %vm403_vm1, %v402_v20, 0  ;;  %vm559_vm15 = vcmp.gt.s32.totalorder %v3090_v41, 0 }
  0x26   : > { %v874_v24 = vand.u32 31, %v872_v21  ;;  %v3078_v26 = vshrl.u32 %v872_v21, 5  ;;  %v3080_v27 = vand.u32 31, %v404_v25  ;;  %v3110_v58 = vshrl.u32 %v404_v25, 5 }
  0x28   : > { %v875_v29 = vsub.s32 32, %v874_v24  ;;  %v877_v31 = vshll.u32 %v2929_v30, %v874_v24  ;;  %v880_v33 = vshll.u32 %v2930_v32, %v874_v24  ;;  %v883_v35 = vshll.u32 %v2931_v34, %v874_v24 }
  0x29   : > { %v886_v37 = vshll.u32 %v2932_v36, %v874_v24  ;;  %v889_v39 = vshll.u32 %v2933_v38, %v874_v24  ;;  %vm892_vm2 = vcmp.lt.s32.totalorder %v3078_v26, 1  ;;  %vm895_vm3 = vcmp.lt.s32.totalorder %v3078_v26, 4 }
  0x2a   : > { %v878_v42 = vshrl.u32 %v2930_v32, %v875_v29  ;;  %v881_v43 = vshrl.u32 %v2931_v34, %v875_v29  ;;  %v884_v44 = vshrl.u32 %v2932_v36, %v875_v29  ;;  %v887_v46 = vshrl.u32 %v2933_v38, %v875_v29 }
  0x2b   : > { %v890_v48 = vshrl.u32 %v2934_v47, %v875_v29  ;;  %v3101_v52 = vsub.s32 32, %v3080_v27  ;;  %v876_v53 = vshrl.u32 %v2929_v30, %v875_v29  ;;  %vm894_vm4 = vcmp.lt.s32.totalorder %v3078_v26, 3 }
  0x2c   : > { %v879_v49 = vor.u32 %v878_v42, %v877_v31  ;;  %v882_v50 = vor.u32 %v881_v43, %v880_v33  ;;  %v885_v51 = vor.u32 %v884_v44, %v883_v35  ;;  %v888_v54 = vor.u32 %v887_v46, %v886_v37 }
  0x2d   : > { %v891_v55 = vor.u32 %v890_v48, %v889_v39  ;;  %vm893_vm5 = vcmp.lt.s32.totalorder %v3078_v26, 2  ;;  %v409_v61 = vshll.u32 %v2929_v30, %v3080_v27  ;;  %v412_v62 = vshll.u32 %v2930_v32, %v3080_v27 }
  0x2e   : > { %v900_v56 = vsel %vm892_vm2, %v879_v49, %v882_v50  ;;  %v904_v57 = vsel %vm892_vm2, %v882_v50, %v885_v51  ;;  %v901_v59 = vsel %vm895_vm3, %v888_v54, 920167782  ;;  %v897_v63 = vsel %vm895_vm3, %v885_v51, 2102212464 }
  0x2f   : > { %v905_v60 = vsel %vm895_vm3, %v891_v55, 1326507024  ;;  %v902_v6 = vsel %vm894_vm4, %v885_v51, %v901_v59  ;;  %v410_v9 = vshrl.u32 %v2930_v32, %v3101_v52  ;;  %v896_v10 = vsel %vm892_vm2, %v876_v53, %v879_v49 }
  0x30   : > { %v906_v8 = vsel %vm894_vm4, %v888_v54, %v905_v60  ;;  %v903_v11 = vsel %vm893_vm5, %v900_v56, %v902_v6  ;;  %v413_v13 = vshrl.u32 %v2931_v34, %v3101_v52  ;;  %v898_v18 = vsel %vm894_vm4, %v882_v50, %v897_v63 }
  0x31   : > { %v907_v12 = vsel %vm893_vm5, %v904_v57, %v906_v8  ;;  %v933_v16 = vand.u32 65535, %v903_v11  ;;  %v934_v17 = vshrl.u32 %v903_v11, 16  ;;  %v3138_v19 = vor.u32 %v410_v9, %v409_v61 }
  0x32   : > { %v911_v14 = vand.u32 65535, %v907_v12  ;;  %v912_v15 = vshrl.u32 %v907_v12, 16  ;;  %v3140_v20 = vor.u32 %v413_v13, %v412_v62  ;;  %v415_v21 = vshll.u32 %v2931_v34, %v3080_v27 }
  0x33   : > { %v416_v29 = vshrl.u32 %v2932_v36, %v3101_v52  ;;  %v935_v33 = vmul.u32 %v933_v16, %v909_v40  ;;  %v936_v35 = vmul.u32 %v934_v17, %v909_v40  ;;  %v937_v37 = vmul.u32 %v933_v16, %v910_v45 }
  0x34   : > { %v913_v23 = vmul.u32 %v911_v14, %v909_v40  ;;  %v914_v24 = vmul.u32 %v912_v15, %v909_v40  ;;  %v915_v25 = vmul.u32 %v911_v14, %v910_v45  ;;  %v916_v31 = vmul.u32 %v912_v15, %v910_v45 }
  0x35   : > { %v938_v44 = vmul.u32 %v934_v17, %v910_v45  ;;  %v939_v48 = vshll.u32 %v936_v35, 16  ;;  %v940_v49 = vshrl.u32 %v936_v35, 16  ;;  %v941_v50 = vshll.u32 %v937_v37, 16 }
  0x36   : > { %v917_v39 = vshll.u32 %v914_v24, 16  ;;  %v918_v42 = vshrl.u32 %v914_v24, 16  ;;  %v919_v43 = vshll.u32 %v915_v25, 16  ;;  %v920_v46 = vshrl.u32 %v915_v25, 16 }
  0x37   : > { %v942_v53 = vshrl.u32 %v937_v37, 16  ;;  %v418_v54 = vshll.u32 %v2932_v36, %v3080_v27  ;;  %vm943_vm7 = vc.u32 %v935_v33, %v939_v48  ;;  %v945_v56 = vadd.s32 %v939_v48, %v935_v33 }
  0x38   : > { %vm921_vm6 = vc.u32 %v913_v23, %v917_v39  ;;  %v923_v51 = vadd.s32 %v917_v39, %v913_v23  ;;  %v419_v40 = vshrl.u32 %v2933_v38, %v3101_v52  ;;  %v944_v45 = vsel %vm943_vm7, 1, %v2928_v0 }
  0x39   : > { %v922_v55 = vsel %vm921_vm6, 1, %v2928_v0  ;;  %v421_v59 = vshll.u32 %v2933_v38, %v3080_v27  ;;  %v946_v61 = vadd.s32 %v944_v45, %v938_v44  ;;  %vm947_vm9 = vc.u32 %v945_v56, %v941_v50 }
  0x3a   : > { %v924_v57 = vadd.s32 %v922_v55, %v916_v31  ;;  %vm925_vm8 = vc.u32 %v923_v51, %v919_v43  ;;  %v417_v62 = vor.u32 %v416_v29, %v415_v21  ;;  %v948_v6 = vsel %vm947_vm9, 1, %v2928_v0 }
  0x3b   : > { %v926_v60 = vsel %vm925_vm8, 1, %v2928_v0  ;;  %v420_v8 = vor.u32 %v419_v40, %v418_v54  ;;  %v422_v9 = vshrl.u32 %v2934_v47, %v3101_v52  ;;  %v3158_v11 = vadd.s32 %v945_v56, %v941_v50 }
  0x3c   : > { %v928_v63 = vadd.s32 %v926_v60, %v924_v57  ;;  %v950_v12 = vadd.s32 %v948_v6, %v946_v61  ;;  %vm424_vm10 = vcmp.lt.s32.totalorder %v3110_v58, 1  ;;  %vm426_vm11 = vcmp.lt.s32.totalorder %v3110_v58, 3 }
  0x3d   : > { %v423_v13 = vor.u32 %v422_v9, %v421_v59  ;;  %vm425_vm12 = vcmp.lt.s32.totalorder %v3110_v58, 2  ;;  %vm427_vm13 = vcmp.lt.s32.totalorder %v3110_v58, 4  ;;  %v899_v14 = vsel %vm893_vm5, %v896_v10, %v898_v18 }
  0x3e   : > { %v929_v27 = vadd.s32 %v928_v63, %v918_v42  ;;  %v951_v15 = vadd.s32 %v950_v12, %v940_v49  ;;  %v432_v16 = vsel %vm424_vm10, %v3138_v19, %v3140_v20  ;;  %v433_v17 = vsel %vm427_vm13, %v420_v8, 920167782 }
  0x3f   : > { %v434_v23 = vsel %vm426_vm11, %v417_v62, %v433_v17  ;;  %v436_v24 = vsel %vm424_vm10, %v3140_v20, %v417_v62  ;;  %v441_v26 = vand.u32 65535, %v3082_v28  ;;  %v437_v25 = vsel %vm427_vm13, %v423_v13, 1326507024 }
  0x40   : > { %v3172_v21 = vadd.s32 %v929_v27, %v920_v46  ;;  %v952_v10 = vadd.s32 %v951_v15, %v942_v53  ;;  %v435_v18 = vsel %vm425_vm12, %v432_v16, %v434_v23  ;;  %v442_v29 = vshrl.u32 %v3082_v28, 16 }
  0x41   : > { %v953_v31 = vmul.u32 %v3076_v22, %v899_v14  ;;  %v438_v33 = vsel %vm426_vm11, %v420_v8, %v437_v25  ;;  %v465_v35 = vand.u32 65535, %v435_v18  ;;  %v466_v42 = vshrl.u32 %v435_v18, 16 }
  0x42   : > { %vm955_vm14 = vc.u32 %v3172_v21, %v3158_v11  ;;  %v956_v37 = vadd.s32 1, %v952_v10  ;;  %v439_v39 = vsel %vm425_vm12, %v436_v24, %v438_v33  ;;  %v408_v43 = vshrl.u32 %v2929_v30, %v3101_v52 }
  0x43   : > { %v443_v44 = vand.u32 65535, %v439_v39  ;;  %v444_v46 = vshrl.u32 %v439_v39, 16  ;;  %v429_v48 = vsel %vm427_vm13, %v417_v62, 2102212464  ;;  %v468_v49 = vmul.u32 %v466_v42, %v441_v26 }
  0x44   : > { %v957_v22 = vsel %vm955_vm14, %v956_v37, %v952_v10  ;;  %v469_v50 = vmul.u32 %v465_v35, %v442_v29  ;;  %v467_v55 = vmul.u32 %v465_v35, %v441_v26  ;;  %v3198_v57 = vsel %vm559_vm15, %v3090_v41, 0 }
  0x45   : > { %v958_v51 = vadd.s32 %v957_v22, %v953_v31  ;;  %v445_v53 = vmul.u32 %v443_v44, %v441_v26  ;;  %v446_v54 = vmul.u32 %v444_v46, %v441_v26  ;;  %v447_v56 = vmul.u32 %v443_v44, %v442_v29 }
  0x46   : > { %v471_v40 = vshll.u32 %v468_v49, 16  ;;  %v428_v45 = vsel %vm424_vm10, %v408_v43, %v3138_v19  ;;  %v448_v59 = vmul.u32 %v444_v46, %v442_v29  ;;  %v430_v61 = vsel %vm426_vm11, %v3140_v20, %v429_v48 }
  0x47   : > { %v959_v52 = vadd.s32 536870912, %v958_v51  ;;  %v449_v60 = vshll.u32 %v446_v54, 16  ;;  %v451_v62 = vshll.u32 %v447_v56, 16  ;;  %v470_v63 = vmul.u32 %v466_v42, %v442_v29 }
  0x48   : > { %v473_v6 = vshll.u32 %v469_v50, 16  ;;  %vm475_vm1 = vc.u32 %v467_v55, %v471_v40  ;;  %v450_v41 = vshrl.u32 %v446_v54, 16  ;;  %v477_v19 = vadd.s32 %v471_v40, %v467_v55 }
  0x49   : > { %v3206_v8 = vshrl.u32 %v959_v52, 30  ;;  %vm453_vm0 = vc.u32 %v445_v53, %v449_v60  ;;  %v455_v9 = vadd.s32 %v449_v60, %v445_v53  ;;  %v476_v27 = vsel %vm475_vm1, 1, %v2928_v0 }
  0x4a   : > { %v454_v12 = vsel %vm453_vm0, 1, %v2928_v0  ;;  %v472_v15 = vshrl.u32 %v468_v49, 16  ;;  %v452_v20 = vshrl.u32 %v447_v56, 16  ;;  %v478_v17 = vadd.s32 %v476_v27, %v470_v63 }
  0x4b   : > { %v961_v13 = vshll.u32 %v3206_v8, 30  ;;  %v456_v14 = vadd.s32 %v454_v12, %v448_v59  ;;  %vm457_vm2 = vc.u32 %v455_v9, %v451_v62  ;;  %vm479_vm3 = vc.u32 %v477_v19, %v473_v6 }
  0x4c   : > { %v458_v16 = vsel %vm457_vm2, 1, %v2928_v0  ;;  %v480_v26 = vsel %vm479_vm3, 1, %v2928_v0  ;;  %v562_v10 = vand.u32 31, %v3198_v57  ;;  %v474_v18 = vshrl.u32 %v469_v50, 16 }
  0x4d   : > { %v962_v23 = vsub.s32 %v958_v51, %v961_v13  ;;  %v460_v24 = vadd.s32 %v458_v16, %v456_v14  ;;  %v482_v25 = vadd.s32 %v480_v26, %v478_v17  ;;  %v3214_v33 = vadd.s32 %v477_v19, %v473_v6 }
  0x4e   : > { %v431_v35 = vsel %vm425_vm12, %v428_v45, %v430_v61  ;;  %v3220_v43 = vsub.s32 32, %v562_v10  ;;  %v548_v50 = vand.u32 2147483647, %v3065_v4  ;;  %v954_v58 = vadd.s32 %v3158_v11, %v3172_v21 }
  0x4f   : > { %vm963_vm4 = vcmp.lt.s32.totalorder %v962_v23, 0  ;;  %v964_v29 = vsub.s32 0, %v962_v23  ;;  %v461_v31 = vadd.s32 %v460_v24, %v450_v41  ;;  %v483_v37 = vadd.s32 %v482_v25, %v472_v15 }
  0x50   : > { %v485_v22 = vmul.u32 %v3082_v28, %v431_v35  ;;  %v568_v51 = vshll.u32 %v2930_v32, %v562_v10  ;;  %v569_v53 = vshrl.u32 %v2931_v34, %v3220_v43  ;;  %v571_v54 = vshll.u32 %v2931_v34, %v562_v10 }
  0x51   : > { %v965_v39 = vsel %vm963_vm4, %v964_v29, %v962_v23  ;;  %v3218_v42 = vadd.s32 %v461_v31, %v452_v20  ;;  %v484_v46 = vadd.s32 %v483_v37, %v474_v18  ;;  %v572_v28 = vshrl.u32 %v2932_v36, %v3220_v43 }
  0x52   : > { %v966_v44 = vclz %v965_v39  ;;  %v574_v56 = vshll.u32 %v2932_v36, %v562_v10  ;;  %v575_v45 = vshrl.u32 %v2933_v38, %v3220_v43  ;;  %v577_v11 = vshll.u32 %v2933_v38, %v562_v10 }
  0x53   : > { %vm487_vm5 = vc.u32 %v3218_v42, %v3214_v33  ;;  %v488_v49 = vadd.s32 1, %v484_v46  ;;  %v578_v61 = vshrl.u32 %v2934_v47, %v3220_v43  ;;  %v555_v62 = vand.u32 8388607, %v548_v50 }
  0x54   : > { %v2627_v48 = vadd.s32 4294967294, %v966_v44  ;;  %v3243_v63 = vshrl.u32 %v3198_v57, 5  ;;  %v984_v41 = vsub.s32 4, %v3206_v8  ;;  %v565_v12 = vshll.u32 %v2929_v30, %v562_v10 }
  0x55   : > { %v489_v55 = vsel %vm487_vm5, %v488_v49, %v484_v46  ;;  %v566_v19 = vshrl.u32 %v2930_v32, %v3220_v43  ;;  %v3249_v13 = vor.u32 %v569_v53, %v568_v51  ;;  %v3251_v14 = vor.u32 %v572_v28, %v571_v54 }
  0x56   : > { %vm2628_vm6 = vcmp.lt.s32.totalorder %v2627_v48, 0  ;;  %v490_v52 = vadd.s32 %v489_v55, %v485_v22  ;;  %v576_v16 = vor.u32 %v575_v45, %v574_v56  ;;  %v579_v17 = vor.u32 %v578_v61, %v577_v11 }
  0x57   : > { %v969_v40 = vsel %vm2628_vm6, 0, %v2627_v48  ;;  %vm862_vm7 = vcmp.lt.s32.totalorder %v3059_v2, 0  ;;  %vm580_vm8 = vcmp.lt.s32.totalorder %v3243_v63, 1  ;;  %vm583_vm9 = vcmp.lt.s32.totalorder %v3243_v63, 4 }
  0x58   : > { %v970_v21 = vsub.s32 32, %v969_v40  ;;  %v971_v59 = vshll.u32 %v962_v23, %v969_v40  ;;  %v974_v60 = vsub.s32 4294967266, %v969_v40  ;;  %v491_v27 = vadd.s32 536870912, %v490_v52 }
  0x59   : > { %v556_v24 = vor.u32 8388608, %v555_v62  ;;  %vm582_vm10 = vcmp.lt.s32.totalorder %v3243_v63, 3  ;;  %v985_v26 = vsel %vm862_vm7, %v984_v41, %v3206_v8  ;;  %v567_v18 = vor.u32 %v566_v19, %v565_v12 }
  0x5a   : > { %v972_v6 = vshrl.u32 %v954_v58, %v970_v21  ;;  %v975_v9 = vadd.s32 127, %v974_v60  ;;  %v3260_v10 = vshrl.u32 %v491_v27, 30  ;;  %vm581_vm11 = vcmp.lt.s32.totalorder %v3243_v63, 2 }
  0x5b   : > { %v589_v29 = vsel %vm583_vm9, %v576_v16, 920167782  ;;  %v592_v31 = vsel %vm580_vm8, %v3249_v13, %v3251_v14  ;;  %v593_v35 = vsel %vm583_vm9, %v579_v17, 1326507024  ;;  %vm3273_vm12 = vcmp.le.f32.partialorder %v860_v5, 0.7853982 }
  0x5c   : > { %v973_v15 = vor.u32 %v972_v6, %v971_v59  ;;  %v976_v20 = vshll.u32 %v975_v9, 23  ;;  %v594_v37 = vsel %vm582_vm10, %v576_v16, %v593_v35  ;;  %v987_v44 = vsel %vm3273_vm12, 0, %v985_v26 }
  0x5d   : > { %v595_v46 = vsel %vm581_vm11, %v592_v31, %v594_v37  ;;  %v3283_v22 = vshll.u32 %v556_v24, 8  ;;  %v588_v48 = vsel %vm580_vm8, %v567_v18, %v3249_v13  ;;  %v590_v5 = vsel %vm582_vm10, %v3251_v14, %v589_v29 }
  0x5e   : > { %v977_v57 = vor.u32 4788187, %v976_v20  ;;  %v980_v23 = vcvt.s32.f32 %v973_v15  ;;  %v599_v49 = vand.u32 65535, %v595_v46  ;;  %v600_v58 = vshrl.u32 %v595_v46, 16 }
  0x5f   : > { %v493_v53 = vshll.u32 %v3260_v10, 30  ;;  %v597_v54 = vand.u32 65535, %v3283_v22  ;;  %v598_v55 = vshrl.u32 %v3283_v22, 16  ;;  %v1004_v28 = vadd.s32 3, %v987_v44 }
  0x60   : > { %v978_v25 = vand.u32 2147483647, %v977_v57  ;;  %v591_v40 = vsel %vm581_vm11, %v588_v48, %v590_v5  ;;  %v3307_v19 = vand.u32 3, %v987_v44  ;;  %v564_v15 = vshrl.u32 %v2929_v30, %v3220_v43 }
  0x61   : > { %v601_v45 = vmul.u32 %v599_v49, %v597_v54  ;;  %v602_v11 = vmul.u32 %v600_v58, %v597_v54  ;;  %v3301_v60 = vsub.s32 %v490_v52, %v493_v53  ;;  %v3303_v61 = vmul.u32 %v599_v49, %v598_v55 }
  0x62   : > { %v981_v39 = vmul.f32 %v980_v23, %v978_v25  ;;  %v3305_v6 = vand.u32 3, %v1004_v28  ;;  %v622_v9 = vshrl.u32 %v591_v40, 16  ;;  %v604_v27 = vmul.u32 %v600_v58, %v598_v55 }
  0x63   : > { %v605_v62 = vshll.u32 %v602_v11, 16  ;;  %v621_v16 = vand.u32 65535, %v591_v40  ;;  %v496_v57 = vsub.s32 0, %v3301_v60  ;;  %v607_v23 = vshll.u32 %v3303_v61, 16 }
  0x64   : > { %v982_v51 = vxor.u32 2147483648, %v981_v39  ;;  %vm495_vm14 = vcmp.lt.s32.totalorder %v3301_v60, 0  ;;  %v624_v26 = vmul.u32 %v622_v9, %v597_v54  ;;  %vm1010_vm15 = vcmp.eq.s32.totalorder %v3305_v6, 2 }
  0x65   : > { %vm609_vm13 = vc.u32 %v601_v45, %v605_v62  ;;  %v611_v24 = vadd.s32 %v605_v62, %v601_v45  ;;  %vm1007_vm0 = vcmp.eq.s32.totalorder %v3305_v6, 0  ;;  %vm1623_vm1 = vcmp.eq.s32.totalorder %v3307_v19, 0 }
  0x66   : > { %v983_v56 = vsel %vm862_vm7, %v982_v51, %v981_v39  ;;  %v610_v20 = vsel %vm609_vm13, 1, %v2928_v0  ;;  %vm1626_vm2 = vcmp.eq.s32.totalorder %v3307_v19, 2  ;;  %v584_v43 = vsel %vm580_vm8, %v564_v15, %v567_v18 }
  0x67   : > { %v986_v21 = vsel %vm3273_vm12, %v3059_v2, %v983_v56  ;;  %v612_v31 = vadd.s32 %v610_v20, %v604_v27  ;;  %v623_v35 = vmul.u32 %v621_v16, %v597_v54  ;;  %v625_v8 = vmul.u32 %v621_v16, %v598_v55 }
  0x68   : > { %v988_v59 = vmul.f32 %v986_v21, %v986_v21  ;;  %vm1006_vm3 = vcmp.lt.s32.totalorder %v3305_v6, 2  ;;  %vm1622_vm4 = vcmp.lt.s32.totalorder %v3307_v19, 2  ;;  %v497_v44 = vsel %vm495_vm14, %v496_v57, %v3301_v60 }
  0x69   : > { %vm613_vm5 = vc.u32 %v611_v24, %v607_v23  ;;  %vm1003_vm6 = vweird.f32 %v3059_v2  ;;  %v606_v46 = vshrl.u32 %v602_v11, 16  ;;  %v626_v5 = vmul.u32 %v622_v9, %v598_v55 }
  0x6a   : > { %v989_v41 = vmul.f32 -0.001358992, %v988_v59  ;;  %v996_v12 = vmul.f32 -0.00019511016, %v988_v59  ;;  %v614_v48 = vsel %vm613_vm5, 1, %v2928_v0  ;;  %v627_v18 = vshll.u32 %v624_v26, 16 }
  0x6b   : > { %v616_v51 = vadd.s32 %v614_v48, %v612_v31  ;;  %v3329_v53 = vmul.f32 12.566371, %v3056_v1  ;;  %v498_v54 = vclz %v497_v44  ;;  %v585_v28 = vsel %vm583_vm9, %v3251_v14, 2102212464 }
  0x6c   : > { %v990_v52 = vadd.f32 0.041655596, %v989_v41  ;;  %v997_v17 = vadd.f32 0.008332121, %v996_v12  ;;  %v629_v56 = vshll.u32 %v625_v8, 16  ;;  %vm631_vm7 = vc.u32 %v623_v35, %v627_v18 }
  0x6d   : > { %vm1658_vm8 = vcmask 1042432   ;;  %v632_v11 = vsel %vm631_vm7, 1, %v2928_v0  ;;  %v608_v55 = vshrl.u32 %v3303_v61, 16  ;;  %v617_v62 = vadd.s32 %v616_v51, %v606_v46 }
  0x6e   : > { %v991_v25 = vmul.f32 %v990_v52, %v988_v59  ;;  %v998_v29 = vmul.f32 %v997_v17, %v988_v59  ;;  %v634_v9 = vadd.s32 %v632_v11, %v626_v5  ;;  %v586_v12 = vsel %vm582_vm10, %v3249_v13, %v585_v28 }
  0x6f   : > { %v707_v14 = vand.u32 2139095040, %v3329_v53  ;;  %v2618_v27 = vadd.s32 4294967294, %v498_v54  ;;  %v628_v15 = vshrl.u32 %v624_v26, 16  ;;  %v3347_v17 = vadd.s32 %v617_v62, %v608_v55 }
  0x70   : > { %v992_v37 = vadd.f32 -0.4999988, %v991_v25  ;;  %v999_v39 = vadd.f32 -0.16666654, %v998_v29  ;;  %v630_v13 = vshrl.u32 %v625_v8, 16 }
  0x71   : > { %v708_v25 = vshrl.u32 %v707_v14, 23  ;;  %vm2619_vm10 = vcmp.lt.s32.totalorder %v2618_v27, 0  ;;  %v704_v51 = vand.u32 2147483647, %v3329_v53 }
  0x72   : > { %v993_v49 = vmul.f32 %v992_v37, %v988_v59  ;;  %v1000_v58 = vmul.f32 %v999_v39, %v988_v59  ;;  %v633_v59 = vadd.s32 %v627_v18, %v623_v35  ;;  %v501_v6 = vsel %vm2619_vm10, 0, %v2618_v27 }
  0x73   : > { %v2623_v8 = vadd.s32 4294967169, %v708_v25  ;;  %v506_v48 = vsub.s32 4294967266, %v501_v6  ;;  %v502_v28 = vsub.s32 32, %v501_v6  ;;  %vm394_vm10 = vcmp.lt.s32.totalorder %v3062_v3, 0 }
  0x74   : > { %v994_v40 = vadd.f32 1.0, %v993_v49  ;;  %v1001_v45 = vadd.f32 1.0, %v1000_v58  ;;  %vm635_vm9 = vc.u32 %v633_v59, %v629_v56  ;;  %v3353_v26 = vadd.s32 %v633_v59, %v629_v56 }
  0x75   : > { %v636_v52 = vsel %vm635_vm9, 1, %v2928_v0  ;;  %v714_v19 = vadd.s32 1, %v2623_v8  ;;  %v507_v56 = vadd.s32 127, %v506_v48 }
  0x76   : > { %v1002_v41 = vmul.f32 %v1001_v45, %v986_v21  ;;  %v1011_v1 = vxor.u32 2147483648, %v994_v40  ;;  %v587_v21 = vsel %vm581_vm11, %v584_v43, %v586_v12  ;;  %v638_v57 = vadd.s32 %v636_v52, %v634_v9 }
  0x77   : > { %vm2935_vm11 = vmmov 1   ;;  %v641_v44 = vmul.u32 %v3283_v22, %v587_v21  ;;  %vm643_vm13 = vc.u32 %v3347_v17, %v3353_v26  ;;  %vm715_vm14 = vcmp.gt.s32.totalorder %v714_v19, 0 }
  0x78   : > { %v1008_v20 = vxor.u32 2147483648, %v1002_v41  ;;  %v1012_v16 = vsel %vm1010_vm15, %v1011_v1, %v1002_v41  ;;  %v1628_v61 = vsel %vm1626_vm2, %v1011_v1, %v1002_v41  ;;  %v639_v31 = vadd.s32 %v638_v57, %v628_v15  ;;  %vm2665_vm12 = vmpackc.low %vm2935_vm11, %vm1658_vm8 }
  0x79   : > { %v716_v2 = vsel %vm715_vm14, %v714_v19, 0  ;;  %v486_v22 = vadd.s32 %v3214_v33, %v3218_v42  ;;  %v711_v41 = vand.u32 8388607, %v704_v51  ;;  %v503_v12 = vshll.u32 %v3301_v60, %v501_v6 }
  0x7a   : > { %v1009_v23 = vsel %vm1007_vm0, %v994_v40, %v1008_v20  ;;  %v1625_v24 = vsel %vm1623_vm1, %v994_v40, %v1008_v20  ;;  %v640_v39 = vadd.s32 %v639_v31, %v630_v13  ;;  %v718_v49 = vand.u32 31, %v716_v2 }
  0x7b   : > { %v1013_v29 = vsel %vm1006_vm3, %v1009_v23, %v1012_v16  ;;  %v1629_v63 = vsel %vm1622_vm4, %v1625_v24, %v1628_v61  ;;  %v3382_v59 = vshrl.u32 %v716_v2, 5  ;;  %v504_v14 = vshrl.u32 %v486_v22, %v502_v28 }
  0x7c   : > { %v3361_v43 = vsel %vm1003_vm6, nan, %v1013_v29  ;;  %v1630_v35 = vsel %vm1003_vm6, nan, %v1629_v63  ;;  %v644_v46 = vadd.s32 1, %v640_v39  ;;  %v3370_v54 = vsub.s32 32, %v718_v49 }
  0x7d   : > { %v2666_v37 = vpack.c.bf16 0.0, %v1630_v35  ;;  %v721_v40 = vshll.u32 %v2929_v30, %v718_v49  ;;  %v724_v55 = vshll.u32 %v2930_v32, %v718_v49  ;;  %v730_v9 = vshll.u32 %v2932_v36, %v718_v49 }
  0x7e   : > { %v645_v5 = vsel %vm643_vm13, %v644_v46, %v640_v39  ;;  %v722_v11 = vshrl.u32 %v2930_v32, %v3370_v54  ;;  %v725_v62 = vshrl.u32 %v2931_v34, %v3370_v54  ;;  %v731_v33 = vshrl.u32 %v2933_v38, %v3370_v54 }
  0x7f   : > { %2667 = vmatpush.bf16.msk.msra.mxu0 %vm2665_vm12, %v2666_v37  ;;  %v646_v18 = vadd.s32 %v645_v5, %v641_v44  ;;  %v727_v1 = vshll.u32 %v2931_v34, %v718_v49  ;;  %v728_v32 = vshrl.u32 %v2932_v36, %v3370_v54  ;;  %v508_v27 = vshll.u32 %v507_v56, 23 }
  0x80   : > { %v3394_v15 = vor.u32 %v722_v11, %v721_v40  ;;  %v3396_v16 = vor.u32 %v725_v62, %v724_v55  ;;  %v733_v61 = vshll.u32 %v2933_v38, %v718_v49  ;;  %v734_v52 = vshrl.u32 %v2934_v47, %v3370_v54 }
  0x81   : > { %v647_v58 = vadd.s32 536870912, %v646_v18  ;;  %v732_v21 = vor.u32 %v731_v33, %v730_v9  ;;  %vm736_vm15 = vcmp.lt.s32.totalorder %v3382_v59, 1  ;;  %v712_v36 = vor.u32 8388608, %v711_v41 }
  0x82   : > { %v729_v13 = vor.u32 %v728_v32, %v727_v1  ;;  %v505_v60 = vor.u32 %v504_v14, %v503_v12  ;;  %v509_v57 = vor.u32 4788187, %v508_v27  ;;  %vm738_vm1 = vcmp.lt.s32.totalorder %v3382_v59, 3 }
  0x83   : > { %v3375_v45 = vshrl.u32 %v647_v58, 30  ;;  %vm739_vm2 = vcmp.lt.s32.totalorder %v3382_v59, 4  ;;  %v735_v24 = vor.u32 %v734_v52, %v733_v61  ;;  %vm737_vm3 = vcmp.lt.s32.totalorder %v3382_v59, 2 }
  0x84   : > { %v744_v38 = vsel %vm736_vm15, %v3394_v15, %v3396_v16  ;;  %v745_v25 = vsel %vm739_vm2, %v732_v21, 920167782  ;;  %v3413_v63 = vshll.u32 %v712_v36, 8  ;;  %v512_v31 = vcvt.s32.f32 %v505_v60 }
  0x85   : > { %v649_v42 = vshll.u32 %v3375_v45, 30  ;;  %v746_v29 = vsel %vm738_vm1, %v729_v13, %v745_v25  ;;  %v510_v37 = vand.u32 2147483647, %v509_v57  ;;  %v642_v39 = vadd.s32 %v3353_v26, %v3347_v17 }
  0x86   : > { %v747_v8 = vsel %vm737_vm3, %v744_v38, %v746_v29  ;;  %v748_v6 = vsel %vm736_vm15, %v3396_v16, %v729_v13  ;;  %v749_v44 = vsel %vm739_vm2, %v735_v24, 1326507024  ;;  %v754_v46 = vshrl.u32 %v3413_v63, 16 }
  0x87   : > { %v650_v20 = vsub.s32 %v646_v18, %v649_v42  ;;  %v750_v19 = vsel %vm738_vm1, %v732_v21, %v749_v44  ;;  %v777_v48 = vand.u32 65535, %v747_v8  ;;  %v753_v17 = vand.u32 65535, %v3413_v63 }
  0x88   : > { %v751_v2 = vsel %vm737_vm3, %v748_v6, %v750_v19  ;;  %v778_v26 = vshrl.u32 %v747_v8, 16  ;;  %v513_v41 = vmul.f32 %v512_v31, %v510_v37  ;;  %v720_v21 = vshrl.u32 %v2929_v30, %v3370_v54 }
  0x89   : > { %vm651_vm0 = vcmp.lt.s32.totalorder %v650_v20, 0  ;;  %v652_v34 = vsub.s32 0, %v650_v20  ;;  %v755_v22 = vand.u32 65535, %v751_v2  ;;  %v756_v28 = vshrl.u32 %v751_v2, 16 }
  0x8a   : > { %v779_v55 = vmul.u32 %v777_v48, %v753_v17  ;;  %v780_v33 = vmul.u32 %v778_v26, %v753_v17  ;;  %v781_v42 = vmul.u32 %v777_v48, %v754_v46  ;;  %v782_v61 = vmul.u32 %v778_v26, %v754_v46 }
  0x8b   : > { %v653_v23 = vsel %vm651_vm0, %v652_v34, %v650_v20  ;;  %v759_v11 = vmul.u32 %v755_v22, %v754_v46  ;;  %v757_v62 = vmul.u32 %v755_v22, %v753_v17  ;;  %v758_v9 = vmul.u32 %v756_v28, %v753_v17 }
  0x8c   : > { %v654_v47 = vclz %v653_v23  ;;  %v760_v12 = vmul.u32 %v756_v28, %v754_v46  ;;  %v783_v52 = vshll.u32 %v780_v33, 16  ;;  %v741_v34 = vsel %vm739_vm2, %v729_v13, 2102212464 }
  0x8d   : > { %v761_v14 = vshll.u32 %v758_v9, 16  ;;  %v763_v27 = vshll.u32 %v759_v11, 16  ;;  %v785_v36 = vshll.u32 %v781_v42, 16  ;;  %v762_v60 = vshrl.u32 %v758_v9, 16 }
  0x8e   : > { %v2621_v35 = vadd.s32 4294967294, %v654_v47  ;;  %vm787_vm6 = vc.u32 %v779_v55, %v783_v52  ;;  %v789_v47 = vadd.s32 %v783_v52, %v779_v55  ;;  %v740_v30 = vsel %vm736_vm15, %v720_v21, %v3394_v15 }
  0x8f   : > { %vm765_vm5 = vc.u32 %v757_v62, %v761_v14  ;;  %v767_v57 = vadd.s32 %v761_v14, %v757_v62  ;;  %v788_v38 = vsel %vm787_vm6, 1, %v2928_v0  ;;  %v784_v13 = vshrl.u32 %v780_v33, 16 }
  0x90   : > { %vm2622_vm4 = vcmp.lt.s32.totalorder %v2621_v35, 0  ;;  %v766_v24 = vsel %vm765_vm5, 1, %v2928_v0  ;;  %v790_v31 = vadd.s32 %v788_v38, %v782_v61  ;;  %vm791_vm9 = vc.u32 %v789_v47, %v785_v36 }
  0x91   : > { %v657_v5 = vsel %vm2622_vm4, 0, %v2621_v35  ;;  %v768_v29 = vadd.s32 %v766_v24, %v760_v12  ;;  %vm769_vm7 = vc.u32 %v767_v57, %v763_v27  ;;  %v742_v35 = vsel %vm738_vm1, %v3396_v16, %v741_v34 }
  0x92   : > { %v658_v18 = vsub.s32 32, %v657_v5  ;;  %v659_v49 = vshll.u32 %v650_v20, %v657_v5  ;;  %v662_v58 = vsub.s32 4294967266, %v657_v5  ;;  %v770_v54 = vsel %vm769_vm7, 1, %v2928_v0 }
  0x93   : > { %v764_v8 = vshrl.u32 %v759_v11, 16  ;;  %v772_v37 = vadd.s32 %v770_v54, %v768_v29  ;;  %v514_v6 = vxor.u32 2147483648, %v513_v41  ;;  %v786_v44 = vshrl.u32 %v781_v42, 16 }
  0x94   : > { %v660_v56 = vshrl.u32 %v642_v39, %v658_v18  ;;  %v663_v40 = vadd.s32 127, %v662_v58  ;;  %v792_v39 = vsel %vm791_vm9, 1, %v2928_v0  ;;  %v793_v15 = vadd.s32 %v789_v47, %v785_v36 }
  0x95   : > { %v794_v19 = vadd.s32 %v792_v39, %v790_v31  ;;  %v773_v48 = vadd.s32 %v772_v37, %v762_v60  ;;  %v743_v5 = vsel %vm737_vm3, %v740_v30, %v742_v35  ;;  %vm3449_vm11 = vcmp.le.f32.partialorder %v392_v7, 0.7853982 }
  0x96   : > { %v661_v1 = vor.u32 %v660_v56, %v659_v49  ;;  %v664_v32 = vshll.u32 %v663_v40, 23  ;;  %v515_v0 = vsel %vm394_vm10, %v514_v6, %v513_v41  ;;  %v797_v49 = vmul.u32 %v3413_v63, %v743_v5 }
  0x97   : > { %v795_v2 = vadd.s32 %v794_v19, %v784_v13  ;;  %v774_v17 = vadd.s32 %v773_v48, %v764_v8  ;;  %vm550_vm13 = vcmp.lt.s32.totalorder %v3065_v4, 0  ;;  %v518_v58 = vsel %vm3449_vm11, %v3062_v3, %v515_v0 }
  0x98   : > { %v665_v20 = vor.u32 4788187, %v664_v32  ;;  %v668_v23 = vcvt.s32.f32 %v661_v1  ;;  %vm3462_vm14 = vcmp.le.f32.partialorder %v548_v50, 0.7853982  ;;  %v520_v63 = vmul.f32 %v518_v58, %v518_v58 }
  0x99   : > { %v796_v26 = vadd.s32 %v795_v2, %v786_v44  ;;  %vm799_vm12 = vc.u32 %v774_v17, %v793_v15  ;;  %v516_v34 = vsub.s32 4, %v3260_v10  ;;  %v672_v47 = vsub.s32 4, %v3375_v45 }
  0x9a   : > { %v666_v25 = vand.u32 2147483647, %v665_v20  ;;  %v528_v62 = vmul.f32 -0.00019511016, %v520_v63  ;;  %v521_v42 = vmul.f32 -0.001358992, %v520_v63 }
  0x9b   : > { %v800_v59 = vadd.s32 1, %v796_v26  ;;  %v517_v30 = vsel %vm394_vm10, %v516_v34, %v3260_v10  ;;  %v673_v44 = vsel %vm550_vm13, %v672_v47, %v3375_v45  ;;  %vm706_vm1 = vcmp.lt.s32.totalorder %v3329_v53, 0 }
  0x9c   : > { %v669_v46 = vmul.f32 %v668_v23, %v666_v25  ;;  %v529_v41 = vadd.f32 0.008332121, %v528_v62  ;;  %v522_v27 = vadd.f32 0.041655596, %v521_v42  ;;  %v798_v23 = vadd.s32 %v793_v15, %v774_v17 }
  0x9d   : > { %v801_v22 = vsel %vm799_vm12, %v800_v59, %v796_v26  ;;  %v519_v6 = vsel %vm3449_vm11, 0, %v517_v30  ;;  %v675_v0 = vsel %vm3462_vm14, 0, %v673_v44  ;;  %vm3494_vm2 = vcmp.le.f32.partialorder %v704_v51, 0.7853982 }
  0x9e   : > { %v670_v18 = vxor.u32 2147483648, %v669_v46  ;;  %v802_v56 = vadd.s32 %v801_v22, %v797_v49  ;;  %v530_v61 = vmul.f32 %v529_v41, %v520_v63  ;;  %v523_v60 = vmul.f32 %v522_v27, %v520_v63 }
  0x9f   : > { %v536_v48 = vadd.s32 3, %v519_v6  ;;  %v1159_v51 = vand.u32 3, %v519_v6 }
  0xa0   : > { %v671_v28 = vsel %vm550_vm13, %v670_v18, %v669_v46  ;;  %v803_v40 = vadd.s32 536870912, %v802_v56  ;;  %v531_v57 = vadd.f32 -0.16666654, %v530_v61  ;;  %v524_v13 = vadd.f32 -0.4999988, %v523_v60 }
  0xa1   : > { %v3471_v11 = vsel %vm3462_vm14, %v3065_v4, %v671_v28  ;;  %v537_v49 = vand.u32 3, %v536_v48  ;;  %v692_v28 = vadd.s32 3, %v675_v0  ;;  %vm1161_vm9 = vcmp.eq.s32.totalorder %v1159_v51, 0 }
  0xa2   : > { %v3473_v55 = vshrl.u32 %v803_v40, 30  ;;  %v676_v50 = vmul.f32 %v3471_v11, %v3471_v11  ;;  %v532_v35 = vmul.f32 %v531_v57, %v520_v63  ;;  %v525_v5 = vmul.f32 %v524_v13, %v520_v63 }
  0xa3   : > { %vm539_vm3 = vcmp.eq.s32.totalorder %v537_v49, 0  ;;  %vm542_vm4 = vcmp.eq.s32.totalorder %v537_v49, 2  ;;  %vm538_vm5 = vcmp.lt.s32.totalorder %v537_v49, 2  ;;  %vm1164_vm10 = vcmp.eq.s32.totalorder %v1159_v51, 2 }
  0xa4   : > { %v805_v9 = vshll.u32 %v3473_v55, 30  ;;  %v684_v1 = vmul.f32 -0.00019511016, %v676_v50  ;;  %v677_v12 = vmul.f32 -0.001358992, %v676_v50  ;;  %v533_v2 = vadd.f32 1.0, %v532_v35 }
  0xa5   : > { %v526_v59 = vadd.f32 1.0, %v525_v5  ;;  %v828_v40 = vsub.s32 4, %v3473_v55  ;;  %vm1160_vm14 = vcmp.lt.s32.totalorder %v1159_v51, 2  ;;  %v390_v5 = vld [vmem:[%s386_s19] sm:$0x7] }
  0xa6   : > { %v806_v33 = vsub.s32 %v802_v56, %v805_v9  ;;  %v685_v20 = vadd.f32 0.008332121, %v684_v1  ;;  %v678_v36 = vadd.f32 0.041655596, %v677_v12  ;;  %v534_v22 = vmul.f32 %v533_v2, %v518_v58 }
  0xa7   : > { %v543_v9 = vxor.u32 2147483648, %v526_v59  ;;  %v693_v58 = vand.u32 3, %v692_v28  ;;  %v829_v41 = vsel %vm706_vm1, %v828_v40, %v3473_v55  ;;  %v1313_v12 = vand.u32 3, %v675_v0 }
  0xa8   : > { %vm807_vm15 = vcmp.lt.s32.totalorder %v806_v33, 0  ;;  %v808_v32 = vsub.s32 0, %v806_v33  ;;  %v686_v24 = vmul.f32 %v685_v20, %v676_v50  ;;  %v679_v54 = vmul.f32 %v678_v36, %v676_v50 }
  0xa9   : > { %v544_v27 = vsel %vm542_vm4, %v543_v9, %v534_v22  ;;  %vm698_vm6 = vcmp.eq.s32.totalorder %v693_v58, 2  ;;  %vm695_vm7 = vcmp.eq.s32.totalorder %v693_v58, 0  ;;  %vm1315_vm11 = vcmp.eq.s32.totalorder %v1313_v12, 0 }
  0xaa   : > { %v809_v14 = vsel %vm807_vm15, %v808_v32, %v806_v33  ;;  %v687_v39 = vadd.f32 -0.16666654, %v686_v24  ;;  %v680_v15 = vadd.f32 -0.4999988, %v679_v54  ;;  %vm1318_vm12 = vcmp.eq.s32.totalorder %v1313_v12, 2 }
  0xab   : > { %v810_v52 = vclz %v809_v14  ;;  %vm694_vm13 = vcmp.lt.s32.totalorder %v693_v58, 2  ;;  %vm1314_vm15 = vcmp.lt.s32.totalorder %v1313_v12, 2  ;;  %v1647_v28 = vrot.slane %v3361_v43, 4 }
  0xac   : > { %v688_v26 = vmul.f32 %v687_v39, %v676_v50  ;;  %v681_v16 = vmul.f32 %v680_v15, %v676_v50  ;;  %v540_v50 = vxor.u32 2147483648, %v534_v22 }
  0xad   : > { %v2624_v21 = vadd.s32 4294967294, %v810_v52  ;;  %v831_v52 = vsel %vm3494_vm2, 0, %v829_v41 }
  0xae   : > { %v689_v45 = vadd.f32 1.0, %v688_v26  ;;  %v682_v62 = vadd.f32 1.0, %v681_v16  ;;  %v541_v14 = vsel %vm539_vm3, %v526_v59, %v540_v50  ;;  %v848_v60 = vadd.s32 3, %v831_v52  ;;  %v389_v26 = vld [vmem:[%s378_s23] sm:$0xf]  ;;  %s2610_s23 = sshll.u32 %s360_s22, 3 }
  0xaf   : > { %vm2625_vm0 = vcmp.lt.s32.totalorder %v2624_v21, 0  ;;  %v1163_v24 = vsel %vm1161_vm9, %v526_v59, %v540_v50  ;;  %vm847_vm9 = vweird.f32 %v3329_v53  ;;  %v1632_v40 = vrot.slane %v389_v26, 5  ;;  %s362_s24 = scalar_lea.vmem [#allocation2], %s2610_s23 }
  0xb0   : > { %v813_v38 = vsel %vm2625_vm0, 0, %v2624_v21  ;;  %v690_v42 = vmul.f32 %v689_v45, %v3471_v11  ;;  %v699_v61 = vxor.u32 2147483648, %v682_v62  ;;  %vm535_vm0 = vweird.f32 %v3062_v3 }
  0xb1   : > { %v814_v25 = vsub.s32 32, %v813_v38  ;;  %v815_v29 = vshll.u32 %v806_v33, %v813_v38  ;;  %v818_v31 = vsub.s32 4294967266, %v813_v38  ;;  %v1166_v38 = vsel %vm1164_vm10, %v543_v9, %v534_v22 }
  0xb2   : > { %v696_v11 = vxor.u32 2147483648, %v690_v42  ;;  %v700_v36 = vsel %vm698_vm6, %v699_v61, %v690_v42  ;;  %v849_v13 = vand.u32 3, %v848_v60  ;;  %v1167_v35 = vsel %vm1160_vm14, %v1163_v24, %v1166_v38  ;;  %v2778_v60 = vld [vmem:[%s3824_s3 + $0x28] sm:$0xff] }
  0xb3   : > { %v816_v8 = vshrl.u32 %v798_v23, %v814_v25  ;;  %v819_v37 = vadd.s32 127, %v818_v31  ;;  %v545_v31 = vsel %vm538_vm5, %v541_v14, %v544_v27  ;;  %v1168_v15 = vsel %vm535_vm0, nan, %v1167_v35 }
  0xb4   : > { %v697_v47 = vsel %vm695_vm7, %v682_v62, %v696_v11  ;;  %v1317_v25 = vsel %vm1315_vm11, %v682_v62, %v696_v11  ;;  %vm850_vm4 = vcmp.lt.s32.totalorder %v849_v13, 2  ;;  %vm851_vm5 = vcmp.eq.s32.totalorder %v849_v13, 0  ;;  %v2774_v11 = vld [vmem:[%s3824_s3 + $0x8] sm:$0xff] }
  0xb5   : > { %v817_v19 = vor.u32 %v816_v8, %v815_v29  ;;  %v820_v46 = vshll.u32 %v819_v37, 23  ;;  %v1320_v29 = vsel %vm1318_vm12, %v699_v61, %v690_v42  ;;  %v1467_v8 = vand.u32 3, %v831_v52 }
  0xb6   : > { %v701_v37 = vsel %vm694_vm13, %v697_v47, %v700_v36  ;;  %v1321_v44 = vsel %vm1314_vm15, %v1317_v25, %v1320_v29  ;;  %v1650_v3 = vrot.slane %v1168_v15, 1  ;;  %vm1662_vm10 = vcmask 1041408   ;;  %v2777_v36 = vld [vmem:[%s3824_s3 + $0x20] sm:$0xff] }
  0xb7   : > { %v821_v10 = vor.u32 4788187, %v820_v46  ;;  %v824_v17 = vcvt.s32.f32 %v817_v19  ;;  %v546_v19 = vsel %vm535_vm0, nan, %v545_v31  ;;  %vm1472_vm3 = vcmp.eq.s32.totalorder %v1467_v8, 2 }
  0xb8   : > { %vm1468_vm6 = vcmp.lt.s32.totalorder %v1467_v8, 2  ;;  %vm1469_vm7 = vcmp.eq.s32.totalorder %v1467_v8, 0  ;;  %v1638_v63 = vrot.slane %v546_v19, 5  ;;  %vm1667_vm11 = vcmask 1040384  }
  0xb9   : > { %v822_v18 = vand.u32 2147483647, %v821_v10  ;;  %vm1673_vm12 = vcmask 1044480   ;;  %vm1669_vm13 = vcmask 1043456   ;;  %vm1660_vm14 = vcmask 1046528  }
  0xba   : > { %vm1665_vm15 = vcmask 1045504   ;;  %vm1721_vm0 = vcmask 392192  }
  0xbb   : > { %v825_v56 = vmul.f32 %v824_v17, %v822_v18  ;;  %v1635_v18 = vrot.slane %v390_v5, 1  ;;  %v1800_v5 = vld [vmem:[%s3828_s7 + $0x48] sm:$0xff] }
  0xbd   : > { %v826_v7 = vxor.u32 2147483648, %v825_v56  ;;  %v1663_v50 = vsel %vm1662_vm10, %v1635_v18, 1.0 }
  0xbf   : > { %v827_v33 = vsel %vm706_vm1, %v826_v7, %v825_v56  ;;  %vm691_vm1 = vweird.f32 %v3065_v4 }
  0xc0   : > { %v830_v1 = vsel %vm3494_vm2, %v3329_v53, %v827_v33  ;;  %v702_v2 = vsel %vm691_vm1, nan, %v701_v37  ;;  %vm854_vm2 = vcmp.eq.s32.totalorder %v849_v13, 2  ;;  %v1322_v10 = vsel %vm691_vm1, nan, %v1321_v44  ;;  %v2871_v53 = vld [vmem:[%s3053_s15] sm:$0x7] }
  0xc1   : > { %v832_v32 = vmul.f32 %v830_v1, %v830_v1  ;;  %v1653_v22 = vrot.slane %v1322_v10, 6  ;;  %v1641_v4 = vrot.slane %v702_v2, 2  ;;  %v1659_v41 = vsel %vm1658_vm8, %v2871_v53, %v1632_v40  ;;  %v1796_v10 = vld [vmem:[%s3828_s7 + $0x28] sm:$0xff] }
  0xc2   : > { %v1661_v27 = vsel %vm1660_vm14, %v1659_v41, %v1635_v18 }
  0xc3   : > { %v833_v20 = vmul.f32 -0.001358992, %v832_v32  ;;  %v840_v21 = vmul.f32 -0.00019511016, %v832_v32  ;;  %v1672_v33 = vsel %vm1662_vm10, %v1650_v3, %v1653_v22 }
  0xc5   : > { %v834_v55 = vadd.f32 0.041655596, %v833_v20  ;;  %v841_v34 = vadd.f32 0.008332121, %v840_v21  ;;  %v2773_v21 = vld [vmem:[%s3824_s3] sm:$0xff] }
  0xc7   : > { %v835_v57 = vmul.f32 %v834_v55, %v832_v32  ;;  %v842_v23 = vmul.f32 %v841_v34, %v832_v32  ;;  %v2775_v55 = vld [vmem:[%s3824_s3 + $0x10] sm:$0xff]  ;;  %v2776_v34 = vld [vmem:[%s3824_s3 + $0x18] sm:$0xff] }
  0xc9   : > { %v836_v30 = vadd.f32 -0.4999988, %v835_v57  ;;  %v843_v54 = vadd.f32 -0.16666654, %v842_v23 }
  0xcb   : > { %v837_v39 = vmul.f32 %v836_v30, %v832_v32  ;;  %v844_v6 = vmul.f32 %v843_v54, %v832_v32 }
  0xcd   : > { %v838_v46 = vadd.f32 1.0, %v837_v39  ;;  %v845_v48 = vadd.f32 1.0, %v844_v6 }
  0xcf   : > { %v846_v17 = vmul.f32 %v845_v48, %v830_v1  ;;  %v855_v0 = vxor.u32 2147483648, %v838_v46  ;;  %v1664_v1 = vsel %vm1658_vm8, %v1663_v50, %v1638_v63  ;;  %v1799_v48 = vld [vmem:[%s3828_s7 + $0x40] sm:$0xff]  ;;  %vm1953_vm8 = vcmask 785408  }
  0xd0   : > { %v1666_v61 = vsel %vm1665_vm15, %v1664_v1, %v1641_v4  ;;  %1869 = vperm.xlu1 %2865, %v1799_v48   ;;  %v1798_v1 = vld [vmem:[%s3828_s7 + $0x38] sm:$0xff]  ;;  %v2262_v48 = vld [vmem:[%s3828_s7 + $0xc8] sm:$0xff] }
  0xd1   : > { %v852_v49 = vxor.u32 2147483648, %v846_v17  ;;  %v856_v16 = vsel %vm854_vm2, %v855_v0, %v846_v17  ;;  %v1474_v59 = vsel %vm1472_vm3, %v855_v0, %v846_v17  ;;  %v1676_v20 = vpack.c.bf16 %v1666_v61, %v1661_v27  ;;  %v1801_v17 = vld [vmem:[%s3828_s7 + $0x50] sm:$0xff]  ;;  %v1814_v27 = vld [vmem:[%s3828_s7 + $0xb8] sm:$0xff]  ;;  %v1792_v61 = vld [vmem:[%s3828_s7 + $0x8] sm:$0xff] }
  0xd2   : > { %1879 = vperm.xlu0 %2864, %v1801_v17  }
  0xd3   : > { %v853_v56 = vsel %vm851_vm5, %v838_v46, %v852_v49  ;;  %v1471_v45 = vsel %vm1469_vm7, %v838_v46, %v852_v49 }
  0xd4   : > { %v857_v7 = vsel %vm850_vm4, %v853_v56, %v856_v16  ;;  %v1475_v62 = vsel %vm1468_vm6, %v1471_v45, %v1474_v59  ;;  %v1791_v56 = vld [vmem:[%s3828_s7] sm:$0xff] }
  0xd5   : > { %v858_v9 = vsel %vm847_vm9, nan, %v857_v7  ;;  %v1476_v58 = vsel %vm847_vm9, nan, %v1475_v62 }
  0xd6   : > { %v1644_v43 = vrot.slane %v858_v9, 7  ;;  %v1656_v42 = vrot.slane %v1476_v58, 3 }
  0xd8   : > { %v1668_v51 = vsel %vm1667_vm11, %v1641_v4, %v1644_v43  ;;  %v1674_v32 = vsel %vm1673_vm12, %v1672_v33, %v1656_v42  ;;  %1874 = vperm.xlu1 %2865, %v1800_v5   ;;  %v1797_v43 = vld [vmem:[%s3828_s7 + $0x30] sm:$0xff]  ;;  %v1802_v42 = vld [vmem:[%s3828_s7 + $0x58] sm:$0xff] }
  0xd9   : > { %v1670_v12 = vsel %vm1669_vm13, %v1668_v51, %v1647_v28  ;;  %1859 = vperm.xlu2 %2866, %v1797_v43   ;;  %v1795_v51 = vld [vmem:[%s3828_s7 + $0x20] sm:$0xff] }
  0xda   : > { %v1671_v14 = vsel %vm1660_vm14, %v1670_v12, %v1650_v3  ;;  %1884 = vperm.xlu0 %2864, %v1802_v42   ;;  %v1793_v12 = vld [vmem:[%s3828_s7 + $0x10] sm:$0xff] }
  0xdb   : > { %v1677_v52 = vpack.c.bf16 %v1674_v32, %v1671_v14  ;;  %v2779_v32 = vld [vmem:[%s3825_s4] sm:$0xff]  ;;  %v1794_v14 = vld [vmem:[%s3828_s7 + $0x18] sm:$0xff] }
  0xdd   : > { %1746 = vmatpush.bf16.msra.mxu0 %v1677_v52  ;;  %v1813_v52 = vld [vmem:[%s3828_s7 + $0xb0] sm:$0xff] }
  0xe0   : > { %1854 = vperm.xlu1 %2865, %v1796_v10  }
  0xe1   : > { %1747 = vmatpush.bf16.msra.mxu0 %v1676_v20  ;;  %1864 = vperm.xlu2 %2866, %v1798_v1   ;;  %v2780_v20 = vld [vmem:[%s3825_s4 + $0x8] sm:$0xff] }
  0xe2   : > { %1849 = vperm.xlu0 %2864, %v1795_v51  }
  0xe4   : > { %2668 = vmatmul.msk.bf16.vlgmr.msra.gmra.mxu0 %vm1721_vm0, %v2773_v21  ;;  %v1812_v21 = vld [vmem:[%s3828_s7 + $0xa8] sm:$0xff] }
  0xe8   : > { %1829 = vperm.xlu1 %2865, %v1791_v56  }
  0xe9   : > { %1839 = vperm.xlu2 %2866, %v1793_v12  }
  0xea   : > { %1844 = vperm.xlu0 %2864, %v1794_v14  }
  0xf0   : > { %2099 = vperm.xlu1 %2865, %v1814_v27  }
  0xf1   : > { %1834 = vperm.xlu2 %2866, %v1792_v61  }
  0xf2   : > { %2094 = vperm.xlu0 %2864, %v1813_v52  }
  0xf4   : > { %2669 = vmatmul.msk.bf16.gmra.mxu0 %vm1721_vm0, %v2774_v11  ;;  %v1809_v11 = vld [vmem:[%s3828_s7 + $0x90] sm:$0xff] }
  0xf8   : > { %2074 = vperm.xlu1 %2865, %v1809_v11  }
  0xfa   : > { %2089 = vperm.xlu0 %2864, %v1812_v21  }
 0x104   : > { %2670 = vmatmul.msk.bf16.gmra.mxu0 %vm1721_vm0, %v2775_v55  ;;  %v1808_v55 = vld [vmem:[%s3828_s7 + $0x88] sm:$0xff] }
 0x105   : > { %2069 = vperm.xlu1 %2865, %v1808_v55  }
 0x114   : > { %2671 = vmatmul.msk.bf16.gmra.mxu0 %vm1721_vm0, %v2776_v34  ;;  %v1807_v34 = vld [vmem:[%s3828_s7 + $0x80] sm:$0xff] }
 0x115   : > { %2064 = vperm.xlu0 %2864, %v1807_v34  }
 0x124   : > { %2672 = vmatmul.msk.bf16.gmra.mxu0 %vm1721_vm0, %v2777_v36  ;;  %v2781_v36 = vld [vmem:[%s3825_s4 + $0x10] sm:$0xff] }
 0x133   : > { %v1860_v5 = vpop.permute.xlu2 %1859 }
 0x134   : > { %2673 = vmatmul.msk.bf16.gmra.mxu0 %vm1721_vm0, %v2778_v60  ;;  %v1806_v60 = vld [vmem:[%s3828_s7 + $0x78] sm:$0xff] }
 0x135   : > { %2059 = vperm.xlu0 %2864, %v1806_v60  }
 0x13b   : > { %v1865_v10 = vpop.permute.xlu2 %1864 }
 0x144   : > { %v1880_v17 = vpop.permute.xlu0 %1879 }
 0x161   : > { %v1749_v57 = vpop.f32.mrf.mxu0 }
 0x162   : > { %v3557_v23 = vpack.c.bf16 %v1749_v57, %v1749_v57  ;;  %v1803_v57 = vld [vmem:[%s3828_s7 + $0x60] sm:$0xff] }
 0x163   : > { %2044 = vperm.xlu1 %2865, %v1803_v57  }
 0x164   : > { %v1929_v47 = vunpack.c.l.b16 %v3557_v23 }
 0x169   : > { %v1751_v24 = vpop.f32.mrf.mxu0 }
 0x16a   : > { %v3559_v38 = vpack.c.bf16 %v1751_v24, %v1751_v24  ;;  %v1811_v24 = vld [vmem:[%s3828_s7 + $0xa0] sm:$0xff] }
 0x16b   : > { %2084 = vperm.xlu2 %2866, %v1811_v24  }
 0x16c   : > { %v1930_v25 = vunpack.c.l.b16 %v3559_v38 }
 0x16e   : > { %v1941_v29 = vpack.c.b16 %v1930_v25, %v1929_v47  ;;  %v2266_v47 = vld [vmem:[%s3828_s7 + $0xe8] sm:$0xff]  ;;  %v2265_v25 = vld [vmem:[%s3828_s7 + $0xe0] sm:$0xff] }
 0x16f   : > { %2294 = vperm.xlu1 %2865, %v2266_v47   ;;  %2289 = vperm.xlu0 %2864, %v2265_v25  }
 0x171   : > { %v1754_v31 = vpop.f32.mrf.mxu0 }
 0x172   : > { %v3563_v30 = vpack.c.bf16 %v1754_v31, %v1754_v31  ;;  %v2264_v31 = vld [vmem:[%s3828_s7 + $0xd8] sm:$0xff] }
 0x174   : > { %v1931_v35 = vunpack.c.l.b16 %v3563_v30 }
 0x177   : > { %2284 = vperm.xlu0 %2864, %v2264_v31  }
 0x179   : > { %v1756_v54 = vpop.f32.mrf.mxu0 }
 0x17a   : > { %v3565_v13 = vpack.c.bf16 %v1756_v54, %v1756_v54  ;;  %v1810_v54 = vld [vmem:[%s3828_s7 + $0x98] sm:$0xff] }
 0x17b   : > { %2079 = vperm.xlu2 %2866, %v1810_v54  }
 0x17c   : > { %v1932_v8 = vunpack.c.l.b16 %v3565_v13 }
 0x17e   : > { %v1942_v37 = vpack.c.b16 %v1932_v8, %v1931_v35  ;;  %v2261_v35 = vld [vmem:[%s3828_s7 + $0xc0] sm:$0xff]  ;;  %v1805_v8 = vld [vmem:[%s3828_s7 + $0x70] sm:$0xff] }
 0x17f   : > { %2269 = vperm.xlu1 %2865, %v2261_v35  }
 0x181   : > { %v1759_v39 = vpop.f32.mrf.mxu0 }
 0x182   : > { %v3603_v50 = vpack.c.bf16 %v1759_v39, %v1759_v39  ;;  %v2357_v39 = vld [vmem:[%s3828_s7 + $0xf8] sm:$0xff] }
 0x183   : > { %2054 = vperm.xlu2 %2866, %v1805_v8   ;;  %2365 = vperm.xlu0 %2864, %v2357_v39  }
 0x184   : > { %v1933_v53 = vunpack.c.l.b16 %v3603_v50 }
 0x189   : > { %v1761_v6 = vpop.f32.mrf.mxu0 }
 0x18a   : > { %v3600_v63 = vpack.c.bf16 %v1761_v6, %v1761_v6  ;;  %v2783_v6 = vld [vmem:[%s3825_s4 + $0x20] sm:$0xff] }
 0x18c   : > { %v1934_v58 = vunpack.c.l.b16 %v3600_v63 }
 0x18e   : > { %v1943_v41 = vpack.c.b16 %v1934_v58, %v1933_v53 }
 0x191   : > { %v1764_v44 = vpop.f32.mrf.mxu0 }
 0x192   : > { %v3597_v45 = vpack.c.bf16 %v1764_v44, %v1764_v44  ;;  %v1804_v44 = vld [vmem:[%s3828_s7 + $0x68] sm:$0xff] }
 0x193   : > { %2049 = vperm.xlu2 %2866, %v1804_v44  }
 0x194   : > { %v1935_v9 = vunpack.c.l.b16 %v3597_v45 }
 0x199   : > { %v1766_v19 = vpop.f32.mrf.mxu0 }
 0x19a   : > { %v3591_v22 = vpack.c.bf16 %v1766_v19, %v1766_v19  ;;  %v2263_v19 = vld [vmem:[%s3828_s7 + $0xd0] sm:$0xff] }
 0x19b   : > { %2279 = vperm.xlu2 %2866, %v2263_v19  }
 0x19c   : > { %v1936_v7 = vunpack.c.l.b16 %v3591_v22 }
 0x19e   : > { %v1944_v33 = vpack.c.b16 %v1936_v7, %v1935_v9 }
 0x1a1   : > { %v1769_v46 = vpop.f32.mrf.mxu0 }
 0x1a2   : > { %v3587_v49 = vpack.c.bf16 %v1769_v46, %v1769_v46  ;;  %v2784_v46 = vld [vmem:[%s3825_s4 + $0x28] sm:$0xff] }
 0x1a3   : > { %2274 = vperm.xlu2 %2866, %v2262_v48  }
 0x1a4   : > { %v1937_v40 = vunpack.c.l.b16 %v3587_v49 }
 0x1a9   : > { %v1771_v15 = vpop.f32.mrf.mxu0 }
 0x1aa   : > { %v3583_v26 = vpack.c.bf16 %v1771_v15, %v1771_v15  ;;  %v1870_v15 = vpop.permute.xlu1 %1869 }
 0x1ac   : > { %v1938_v28 = vunpack.c.l.b16 %v3583_v26 }
 0x1ae   : > { %v1945_v62 = vpack.c.b16 %v1938_v28, %v1937_v40  ;;  %v1885_v28 = vpop.permute.xlu0 %1884 }
 0x1b1   : > { %v1774_v2 = vpop.f32.mrf.mxu0 }
 0x1b2   : > { %v3581_v0 = vpack.c.bf16 %v1774_v2, %v1774_v2  ;;  %v1875_v2 = vpop.permute.xlu1 %1874 }
 0x1b4   : > { %v1939_v59 = vunpack.c.l.b16 %v3581_v0 }
 0x1b9   : > { %v1776_v3 = vpop.f32.mrf.mxu0 }
 0x1ba   : > { %v3585_v18 = vpack.c.bf16 %v1776_v3, %v1776_v3  ;;  %v1855_v3 = vpop.permute.xlu1 %1854 }
 0x1bc   : > { %v1940_v16 = vunpack.c.l.b16 %v3585_v18 }
 0x1be   : > { %v1946_v4 = vpack.c.b16 %v1940_v16, %v1939_v59  ;;  %v1840_v16 = vpop.permute.xlu2 %1839 }
 0x1c0   : > { %1974 = vmatpush.bf16.msra.mxu1 %v1946_v4 }
 0x1c2   : > { %v1830_v4 = vpop.permute.xlu1 %1829 }
 0x1c4   : > { %1975 = vmatpush.bf16.msra.mxu1 %v1945_v62 }
 0x1c6   : > { %v1835_v56 = vpop.permute.xlu2 %1834 }
 0x1c8   : > { %1976 = vmatpush.bf16.msra.mxu1 %v1944_v33  ;;  %v1850_v33 = vpop.permute.xlu0 %1849 }
 0x1cc   : > { %1977 = vmatpush.bf16.msra.mxu1 %v1943_v41 }
 0x1d0   : > { %1978 = vmatpush.bf16.msra.mxu1 %v1942_v37  ;;  %v2356_v37 = vld [vmem:[%s3828_s7 + $0xf0] sm:$0xff]  ;;  %v1845_v53 = vpop.permute.xlu0 %1844 }
 0x1d1   : > { %2360 = vperm.xlu1 %2865, %v2356_v37  }
 0x1d4   : > { %1979 = vmatpush.bf16.msra.mxu1 %v1941_v29  ;;  %v2782_v29 = vld [vmem:[%s3825_s4 + $0x18] sm:$0xff] }
 0x1d7   : > { %2698 = vmatmul.msk.bf16.vlgmr.msra.gmra.mxu1 %vm1953_vm8, %v2779_v32 }
 0x1e7   : > { %2699 = vmatmul.msk.bf16.gmra.mxu1 %vm1953_vm8, %v2780_v20 }
 0x1f7   : > { %2700 = vmatmul.msk.bf16.gmra.mxu1 %vm1953_vm8, %v2781_v36 }
 0x207   : > { %2701 = vmatmul.msk.bf16.gmra.mxu1 %vm1953_vm8, %v2782_v29 }
 0x217   : > { %2702 = vmatmul.msk.bf16.gmra.mxu1 %vm1953_vm8, %v2783_v6 }
 0x227   : > { %2703 = vmatmul.msk.bf16.gmra.mxu1 %vm1953_vm8, %v2784_v46 }
 0x254   : > { %v1981_v59 = vpop.f32.mrf.mxu1 }
 0x255   : > { %v1982_v40 = vadd.f32 %v1981_v59, %v1830_v4  ;;  %v2790_v59 = vld [vmem:[%s3825_s4 + $0x58] sm:$0xff]  ;;  %v3739_v4 = vpop.permute.xlu2 %2084 }
 0x257   : > { %v2011_v9 = vmax.f32 %v1982_v40, 0.0 }
 0x25c   : > { %v1983_v7 = vpop.f32.mrf.mxu1 }
 0x25d   : > { %v1984_v62 = vadd.f32 %v1983_v7, %v1835_v56  ;;  %v2080_v40 = vpop.permute.xlu2 %2079 }
 0x25f   : > { %v2012_v58 = vmax.f32 %v1984_v62, 0.0  ;;  %v3741_v62 = vpop.permute.xlu0 %2094 }
 0x261   : > { %v2023_v43 = vpack.c.bf16 %v2012_v58, %v2011_v9 }
 0x264   : > { %v1986_v42 = vpop.f32.mrf.mxu1 }
 0x265   : > { %v1987_v41 = vadd.f32 %v1986_v42, %v1840_v16  ;;  %v2789_v16 = vld [vmem:[%s3825_s4 + $0x50] sm:$0xff]  ;;  %v2055_v9 = vpop.permute.xlu2 %2054 }
 0x267   : > { %v2013_v32 = vmax.f32 %v1987_v41, 0.0 }
 0x26c   : > { %v1988_v1 = vpop.f32.mrf.mxu1 }
 0x26d   : > { %v1989_v51 = vadd.f32 %v1988_v1, %v1845_v53  ;;  %v3743_v53 = vpop.permute.xlu0 %2089  ;;  %v2213_v1 = vunpack.c.l.bf16 %v3557_v23 }
 0x26f   : > { %v2014_v12 = vmax.f32 %v1989_v51, 0.0 }
 0x271   : > { %v2024_v14 = vpack.c.bf16 %v2014_v12, %v2013_v32  ;;  %v2050_v32 = vpop.permute.xlu2 %2049 }
 0x274   : > { %v1991_v27 = vpop.f32.mrf.mxu1 }
 0x275   : > { %v1992_v44 = vadd.f32 %v1991_v27, %v1850_v33 }
 0x27c   : > { %v1993_v61 = vpop.f32.mrf.mxu1 }
 0x27d   : > { %v1994_v37 = vadd.f32 %v1993_v61, %v1855_v3  ;;  %v2788_v3 = vld [vmem:[%s3825_s4 + $0x48] sm:$0xff] }
 0x27f   : > { %v2016_v46 = vmax.f32 %v1994_v37, 0.0 }
 0x284   : > { %v1996_v52 = vpop.f32.mrf.mxu1 }
 0x285   : > { %v1997_v35 = vadd.f32 %v1996_v52, %v1860_v5  ;;  %v2786_v5 = vld [vmem:[%s3825_s4 + $0x38] sm:$0xff] }
 0x287   : > { %v2017_v19 = vmax.f32 %v1997_v35, 0.0 }
 0x28c   : > { %v1998_v20 = vpop.f32.mrf.mxu1 }
 0x28d   : > { %v1999_v29 = vadd.f32 %v1998_v20, %v1865_v10  ;;  %v2787_v10 = vld [vmem:[%s3825_s4 + $0x40] sm:$0xff]  ;;  %v2065_v20 = vpop.permute.xlu0 %2064 }
 0x28f   : > { %v2018_v39 = vmax.f32 %v1999_v29, 0.0 }
 0x291   : > { %v2026_v48 = vpack.c.bf16 %v2018_v39, %v2017_v19 }
 0x294   : > { %v2001_v21 = vpop.f32.mrf.mxu1 }
 0x295   : > { %v2002_v24 = vadd.f32 %v2001_v21, %v1870_v15  ;;  %v2785_v15 = vld [vmem:[%s3825_s4 + $0x30] sm:$0xff]  ;;  %v2214_v21 = vunpack.c.l.bf16 %v3559_v38 }
 0x297   : > { %v2019_v8 = vmax.f32 %v2002_v24, 0.0  ;;  %v2215_v24 = vunpack.c.l.bf16 %v3563_v30 }
 0x29c   : > { %v2003_v11 = vpop.f32.mrf.mxu1 }
 0x29d   : > { %v2004_v60 = vadd.f32 %v2003_v11, %v1875_v2 }
 0x29f   : > { %v2020_v31 = vmax.f32 %v2004_v60, 0.0 }
 0x2a1   : > { %v2027_v6 = vpack.c.bf16 %v2020_v31, %v2019_v8  ;;  %v2216_v8 = vunpack.c.l.bf16 %v3565_v13  ;;  %v2218_v13 = vunpack.c.l.bf16 %v3600_v63 }
 0x2a4   : > { %v2006_v55 = vpop.f32.mrf.mxu1 }
 0x2a5   : > { %v2007_v34 = vadd.f32 %v2006_v55, %v1880_v17  ;;  %v2015_v17 = vmax.f32 %v1992_v44, 0.0 }
 0x2a7   : > { %v2021_v47 = vmax.f32 %v2007_v34, 0.0  ;;  %v2025_v2 = vpack.c.bf16 %v2016_v46, %v2015_v17 }
 0x2ac   : > { %v2008_v36 = vpop.f32.mrf.mxu1 }
 0x2ad   : > { %v2009_v57 = vadd.f32 %v2008_v36, %v1885_v28  ;;  %v3737_v28 = vpop.permute.xlu1 %2099 }
 0x2af   : > { %v2022_v25 = vmax.f32 %v2009_v57, 0.0 }
 0x2b1   : > { %v2028_v54 = vpack.c.bf16 %v2022_v25, %v2021_v47  ;;  %v2060_v25 = vpop.permute.xlu0 %2059 }
 0x2b3   : > { %2152 = vmatpush.bf16.msra.mxu2 %v2028_v54 }
 0x2b5   : > { %v2075_v56 = vpop.permute.xlu1 %2074 }
 0x2b7   : > { %2153 = vmatpush.bf16.msra.mxu2 %v2027_v6 }
 0x2bb   : > { %2154 = vmatpush.bf16.msra.mxu2 %v2026_v48  ;;  %v2217_v48 = vunpack.c.l.bf16 %v3603_v50 }
 0x2bd   : > { %v2070_v7 = vpop.permute.xlu1 %2069 }
 0x2bf   : > { %2155 = vmatpush.bf16.msra.mxu2 %v2025_v2 }
 0x2c3   : > { %2156 = vmatpush.bf16.msra.mxu2 %v2024_v14 }
 0x2c5   : > { %v2045_v58 = vpop.permute.xlu1 %2044 }
 0x2c7   : > { %2157 = vmatpush.bf16.msra.mxu2 %v2023_v43 }
 0x2ca   : > { %2740 = vmatmul.msk.bf16.vlgmr.msra.gmra.mxu2 %vm1953_vm8, %v2785_v15 }
 0x2da   : > { %2741 = vmatmul.msk.bf16.gmra.mxu2 %vm1953_vm8, %v2786_v5 }
 0x2ea   : > { %2742 = vmatmul.msk.bf16.gmra.mxu2 %vm1953_vm8, %v2787_v10 }
 0x2fa   : > { %2743 = vmatmul.msk.bf16.gmra.mxu2 %vm1953_vm8, %v2788_v3 }
 0x30a   : > { %2744 = vmatmul.msk.bf16.gmra.mxu2 %vm1953_vm8, %v2789_v16 }
 0x31a   : > { %2745 = vmatmul.msk.bf16.gmra.mxu2 %vm1953_vm8, %v2790_v59 }
 0x34d   : > { %v2159_v33 = vpop.f32.mrf.mxu2 }
 0x34e   : > { %v2160_v43 = vadd.f32 %v2159_v33, %v2045_v58 }
 0x350   : > { %v2189_v42 = vmax.f32 %v2160_v43, 0.0 }
 0x352   : > { %v2201_v41 = vpack.c.bf16 %v2189_v42, %v2189_v42 }
 0x354   : > { %v2225_v51 = vunpack.c.l.bf16 %v2201_v41 }
 0x355   : > { %v2161_v12 = vpop.f32.mrf.mxu2 }
 0x356   : > { %v2162_v14 = vadd.f32 %v2161_v12, %v2050_v32  ;;  %v3746_v27 = vadd.f32 %v2225_v51, %v2213_v1  ;;  %v2219_v12 = vunpack.c.l.bf16 %v3597_v45  ;;  %v2222_v45 = vunpack.c.l.bf16 %v3583_v26 }
 0x358   : > { %v2190_v61 = vmax.f32 %v2162_v14, 0.0 }
 0x35a   : > { %v2202_v52 = vpack.c.bf16 %v2190_v61, %v2190_v61 }
 0x35c   : > { %v2226_v11 = vunpack.c.l.bf16 %v2202_v52 }
 0x35d   : > { %v2164_v55 = vpop.f32.mrf.mxu2 }
 0x35e   : > { %v2165_v34 = vadd.f32 %v2164_v55, %v2055_v9  ;;  %v3749_v36 = vadd.f32 %v2226_v11, %v2214_v21 }
 0x360   : > { %v2191_v60 = vmax.f32 %v2165_v34, 0.0  ;;  %v2249_v23 = vpack.c.bf16 %v3749_v36, %v3746_v27  ;;  %v2290_v27 = vpop.permute.xlu0 %2289 }
 0x362   : > { %v2203_v57 = vpack.c.bf16 %v2191_v60, %v2191_v60 }
 0x364   : > { %v2227_v47 = vunpack.c.l.bf16 %v2203_v57 }
 0x365   : > { %v2166_v29 = vpop.f32.mrf.mxu2 }
 0x366   : > { %v2167_v31 = vadd.f32 %v2166_v29, %v2060_v25  ;;  %v3754_v54 = vadd.f32 %v2227_v47, %v2215_v24  ;;  %v2221_v24 = vunpack.c.l.bf16 %v3587_v49  ;;  %v2224_v49 = vunpack.c.l.bf16 %v3585_v18  ;;  %v2793_v18 = vld [vmem:[%s3826_s5 + $0x10] sm:$0xff] }
 0x368   : > { %v2192_v35 = vmax.f32 %v2167_v31, 0.0 }
 0x36a   : > { %v2204_v38 = vpack.c.bf16 %v2192_v35, %v2192_v35 }
 0x36c   : > { %v2228_v37 = vunpack.c.l.bf16 %v2204_v38 }
 0x36d   : > { %v2169_v39 = vpop.f32.mrf.mxu2 }
 0x36e   : > { %v2170_v6 = vadd.f32 %v2169_v39, %v2065_v20  ;;  %v3757_v44 = vadd.f32 %v2228_v37, %v2216_v8 }
 0x370   : > { %v2193_v19 = vmax.f32 %v2170_v6, 0.0  ;;  %v2250_v46 = vpack.c.bf16 %v3757_v44, %v3754_v54  ;;  %v2223_v6 = vunpack.c.l.bf16 %v3581_v0  ;;  %v2792_v0 = vld [vmem:[%s3826_s5 + $0x8] sm:$0xff] }
 0x372   : > { %v2205_v30 = vpack.c.bf16 %v2193_v19, %v2193_v19 }
 0x374   : > { %v2229_v17 = vunpack.c.l.bf16 %v2205_v30 }
 0x375   : > { %v2171_v2 = vpop.f32.mrf.mxu2 }
 0x376   : > { %v2172_v15 = vadd.f32 %v2171_v2, %v2070_v7  ;;  %v2241_v5 = vadd.f32 %v2229_v17, %v2217_v48  ;;  %v2220_v7 = vunpack.c.l.bf16 %v3591_v22  ;;  %v2295_v2 = vpop.permute.xlu1 %2294 }
 0x378   : > { %v2194_v10 = vmax.f32 %v2172_v15, 0.0 }
 0x37a   : > { %v2206_v3 = vpack.c.bf16 %v2194_v10, %v2194_v10 }
 0x37c   : > { %v2230_v16 = vunpack.c.l.bf16 %v2206_v3 }
 0x37d   : > { %v2174_v59 = vpop.f32.mrf.mxu2 }
 0x37e   : > { %v2175_v9 = vadd.f32 %v2174_v59, %v2075_v56  ;;  %v2242_v58 = vadd.f32 %v2230_v16, %v2218_v13 }
 0x380   : > { %v2251_v33 = vpack.c.bf16 %v2242_v58, %v2241_v5  ;;  %v2195_v43 = vmax.f32 %v2175_v9, 0.0  ;;  %v2285_v5 = vpop.permute.xlu0 %2284 }
 0x382   : > { %v2207_v41 = vpack.c.bf16 %v2195_v43, %v2195_v43 }
 0x384   : > { %v2231_v32 = vunpack.c.l.bf16 %v2207_v41  ;;  %v2270_v41 = vpop.permute.xlu1 %2269 }
 0x385   : > { %v2176_v42 = vpop.f32.mrf.mxu2 }
 0x386   : > { %v2177_v1 = vadd.f32 %v2176_v42, %v2080_v40  ;;  %v2243_v52 = vadd.f32 %v2231_v32, %v2219_v12 }
 0x388   : > { %v2196_v51 = vmax.f32 %v2177_v1, 0.0 }
 0x38a   : > { %v2208_v50 = vpack.c.bf16 %v2196_v51, %v2196_v51 }
 0x38c   : > { %v2232_v14 = vunpack.c.l.bf16 %v2208_v50 }
 0x38d   : > { %v2179_v61 = vpop.f32.mrf.mxu2 }
 0x38e   : > { %v2180_v63 = vadd.f32 %v2179_v61, %v3739_v4  ;;  %v2244_v20 = vadd.f32 %v2232_v14, %v2220_v7  ;;  %v2794_v14 = vld [vmem:[%s3827_s6] sm:$0xff] }
 0x390   : > { %v2252_v56 = vpack.c.bf16 %v2244_v20, %v2243_v52  ;;  %v2197_v21 = vmax.f32 %v2180_v63, 0.0  ;;  %v2366_v63 = vpop.permute.xlu0 %2365 }
 0x392   : > { %v2209_v55 = vpack.c.bf16 %v2197_v21, %v2197_v21 }
 0x394   : > { %v2233_v60 = vunpack.c.l.bf16 %v2209_v55 }
 0x395   : > { %v2181_v11 = vpop.f32.mrf.mxu2 }
 0x396   : > { %v2182_v34 = vadd.f32 %v2181_v11, %v3743_v53  ;;  %v2245_v4 = vadd.f32 %v2233_v60, %v2221_v24  ;;  %v2390_v11 = vlaneseq }
 0x398   : > { %v2198_v40 = vmax.f32 %v2182_v34, 0.0  ;;  %v2391_v34 = vshrl.u32 %v2390_v11, 7 }
 0x39a   : > { %v2210_v57 = vpack.c.bf16 %v2198_v40, %v2198_v40  ;;  %v2392_v60 = vadd.s32 8, %v2391_v34 }
 0x39c   : > { %v2234_v22 = vunpack.c.l.bf16 %v2210_v57  ;;  %vm2394_vm1 = vcmp.ge.s32.totalorder %v2392_v60, 9  ;;  %vm2396_vm2 = vcmp.le.s32.totalorder %v2392_v60, 11 }
 0x39d   : > { %v2184_v47 = vpop.f32.mrf.mxu2  ;;  %vm2398_vm4 = vmand %vm2394_vm1, %vm2396_vm2 }
 0x39e   : > { %v2185_v25 = vadd.f32 %v2184_v47, %v3741_v62  ;;  %v2246_v29 = vadd.f32 %v2234_v22, %v2222_v45 }
 0x3a0   : > { %v2253_v31 = vpack.c.bf16 %v2246_v29, %v2245_v4  ;;  %v2199_v54 = vmax.f32 %v2185_v25, 0.0  ;;  %v2361_v29 = vpop.permute.xlu1 %2360 }
 0x3a2   : > { %v2211_v38 = vpack.c.bf16 %v2199_v54, %v2199_v54 }
 0x3a4   : > { %v2235_v37 = vunpack.c.l.bf16 %v2211_v38 }
 0x3a5   : > { %v2186_v35 = vpop.f32.mrf.mxu2 }
 0x3a6   : > { %v2187_v8 = vadd.f32 %v2186_v35, %v3737_v28  ;;  %v2247_v44 = vadd.f32 %v2235_v37, %v2223_v6  ;;  %v2791_v28 = vld [vmem:[%s3826_s5] sm:$0xff] }
 0x3a8   : > { %v2200_v53 = vmax.f32 %v2187_v8, 0.0 }
 0x3aa   : > { %v2212_v39 = vpack.c.bf16 %v2200_v53, %v2200_v53 }
 0x3ac   : > { %v2236_v26 = vunpack.c.l.bf16 %v2212_v39 }
 0x3ae   : > { %v2248_v19 = vadd.f32 %v2236_v26, %v2224_v49 }
 0x3b0   : > { %v2254_v30 = vpack.c.bf16 %v2248_v19, %v2247_v44 }
 0x3b2   : > { %2323 = vmatpush.bf16.msra.mxu3 %v2254_v30 }
 0x3b6   : > { %2324 = vmatpush.bf16.msra.mxu3 %v2253_v31 }
 0x3ba   : > { %2325 = vmatpush.bf16.msra.mxu3 %v2252_v56 }
 0x3be   : > { %2326 = vmatpush.bf16.msra.mxu3 %v2251_v33 }
 0x3c2   : > { %2327 = vmatpush.bf16.msra.mxu3 %v2250_v46 }
 0x3c6   : > { %2328 = vmatpush.bf16.msra.mxu3 %v2249_v23  ;;  %v2280_v23 = vpop.permute.xlu2 %2279 }
 0x3c9   : > { %2758 = vmatmul.msk.bf16.vlgmr.msra.gmra.mxu3 %vm1953_vm8, %v2791_v28 }
 0x3ce   : > { %v2275_v58 = vpop.permute.xlu2 %2274 }
 0x3d9   : > { %2759 = vmatmul.msk.bf16.gmra.mxu3 %vm1953_vm8, %v2792_v0 }
 0x3e9   : > { %2760 = vmatmul.msk.bf16.gmra.mxu3 %vm1953_vm8, %v2793_v18 }
 0x44c   : > { %v2330_v62 = vpop.f32.mrf.mxu3 }
 0x44d   : > { %v2331_v1 = vadd.f32 %v2330_v62, %v2270_v41 }
 0x44f   : > { %v2345_v12 = vmax.f32 %v2331_v1, 0.0 }
 0x454   : > { %v2332_v46 = vpop.f32.mrf.mxu3 }
 0x455   : > { %v2333_v33 = vadd.f32 %v2332_v46, %v2275_v58 }
 0x457   : > { %v2346_v32 = vmax.f32 %v2333_v33, 0.0 }
 0x459   : > { %v2351_v7 = vpack.c.bf16 %v2346_v32, %v2345_v12 }
 0x45c   : > { %v2335_v48 = vpop.f32.mrf.mxu3 }
 0x45d   : > { %v2336_v16 = vadd.f32 %v2335_v48, %v2280_v23 }
 0x45f   : > { %v2347_v51 = vmax.f32 %v2336_v16, 0.0 }
 0x464   : > { %v2337_v17 = vpop.f32.mrf.mxu3 }
 0x465   : > { %v2338_v3 = vadd.f32 %v2337_v17, %v2285_v5 }
 0x467   : > { %v2348_v43 = vmax.f32 %v2338_v3, 0.0 }
 0x469   : > { %v2352_v50 = vpack.c.bf16 %v2348_v43, %v2347_v51 }
 0x46c   : > { %v2340_v36 = vpop.f32.mrf.mxu3 }
 0x46d   : > { %v2341_v15 = vadd.f32 %v2340_v36, %v2290_v27 }
 0x46f   : > { %v2349_v59 = vmax.f32 %v2341_v15, 0.0 }
 0x474   : > { %v2342_v10 = vpop.f32.mrf.mxu3 }
 0x475   : > { %v2343_v13 = vadd.f32 %v2342_v10, %v2295_v2 }
 0x477   : > { %v2350_v9 = vmax.f32 %v2343_v13, 0.0 }
 0x479   : > { %v2353_v42 = vpack.c.bf16 %v2350_v9, %v2349_v59 }
 0x47b   : > { %2381 = vmatpush.bf16.msrb.mxu3 %v2353_v42 }
 0x47f   : > { %2382 = vmatpush.bf16.msrb.mxu3 %v2352_v50 }
 0x483   : > { %2383 = vmatpush.bf16.msrb.mxu3 %v2351_v7 }
 0x486   : > { %2765 = vmatmul.msk.bf16.vlgmr.msrb.gmra.mxu3 %vm1721_vm0, %v2794_v14 }
 0x509   : > { %v2385_v61 = vpop.f32.mrf.mxu3 }
 0x50a   : > { %v2386_v54 = vadd.f32 %v2385_v61, %v2361_v29 }
 0x511   : > { %v2387_v52 = vpop.f32.mrf.mxu3 }
 0x512   : > { %v2388_v20 = vadd.f32 %v2387_v52, %v2366_v63 }
 0x514   : > { %v2767_v56 = vmul.f32 -1.442695, %v2388_v20 }
 0x516   : > { %2867 = vpow2.f32 %v2767_v56 }
 0x51c   : > { %v2868_v21 = vpop.eup %2867 }
 0x51d   : > { %v2406_v55 = vadd.f32 1.0, %v2868_v21 }
 0x51f   : > { %2869 = vrcp.f32 %v2406_v55  ;;  %v2433_v45 = vand.u32 2147483648, %v2406_v55  ;;  %v2431_v47 = vand.u32 2147483647, %v2406_v55  ;;  %vm2427_vm5 = vweird.f32 %v2406_v55 }
 0x521   : > { %v2434_v4 = vor.u32 1.1754944e-38, %v2433_v45  ;;  %vm2432_vm7 = vcmp.eq.f32.partialorder %v2431_v47, 8.507059e+37 }
 0x525   : > { %v2870_v40 = vpop.eup %2869 }
 0x526   : > { %v2423_v57 = vmul.f32 %v2870_v40, %v2406_v55  ;;  %vm2428_vm3 = vweird.f32 %v2870_v40 }
 0x527   : > { %vm2429_vm6 = vmor %vm2427_vm5, %vm2428_vm3 }
 0x528   : > { %v2424_v24 = vsub.f32 1.0, %v2423_v57 }
 0x52a   : > { %v2425_v22 = vmul.f32 %v2870_v40, %v2424_v24 }
 0x52c   : > { %v2426_v25 = vadd.f32 %v2870_v40, %v2425_v22 }
 0x52e   : > { %v2430_v31 = vsel %vm2429_vm6, %v2870_v40, %v2426_v25 }
 0x52f   : > { %v2435_v35 = vsel %vm2432_vm7, %v2434_v4, %v2430_v31  ;;  %2449 = sbr.rel (!%p3027_p5) target bundleno = 1341 (0x53d), region = 56 }
 0x530   : > { %v2438_v38 = vsel %vm2398_vm4, %v2435_v35, %v2388_v20 }
 0x531   : > { %v2798_v8 = vpack.c.bf16 %v2438_v38, %v2386_v54 }
 0x533   : > { %2799 = vst [vmem:[%s362_s24] sm:$0xff] %v2798_v8  }
 0x53a   : > { %v2470_v53 = vld [vmem:[%s362_s24] sm:$0xf]  ;;  %v2472_v37 = vld [vmem:[%s362_s24 + $0x4] sm:$0xf] }
 0x53b   : > { %2471 = vst [vmem:[%s2453_s17] sm:$0xf] %v2470_v53 }
 0x53c   : > { %2473 = vst [vmem:[%s2453_s17 + $0x8] sm:$0xf] %v2472_v37 }
 0x53d PF: > { %s18_s11 = sadd.s32 1, %s2926_s11   ;;  %s3839_s27 = smov %s2906_s28 }
 0x53e   : > { %p15_p11 = scmp.ge.s32.totalorder %s18_s11, 6   ;;  %s3840_s28 = smov %s3038_s20 }
 0x53f   : > { %s3841_s29 = smov %s2918_s9  ;;  %s3842_s30 = smov %s2922_s10 }
 0x540   : > { %s3843_s9 = smov %s3846_s12  ;;  %s3844_s10 = smov %s3850_s13 }
 0x541   :  { %17 = sbr.rel (!%p15_p11) target bundleno = 4 (0x4), region = 130 }

</bundles_post_ra>
